<compile_context>
chip_gen: v6e
topology: v6e:2x2x1
jax: 0.10.0
libtpu: 0.0.40
codegen_flags: <defaults>
</compile_context>

<pallas_src>
import functools

import jax
import jax.numpy as jnp
from jax import lax
from jax.experimental import pallas as pl
from jax.experimental.pallas import tpu as pltpu


# --------------------------------------------------------------------------
# Kernels
# --------------------------------------------------------------------------
def _bilstm_chunk_kernel(len_ref, gxf_ref, gxb_ref, whhf_ref, whhb_ref,
                         outf_ref, outb_ref, hf, cf, hb, cb, *, tc, hidden):
    """Fused forward+backward LSTM over one time-chunk (TC steps).

    len_ref : (Bp, 1)      int32 sequence lengths (padded rows = 0)
    gxf_ref : (TC, Bp, 4H) f32 precomputed x@W_ih+b, forward, chunk ci
    gxb_ref : (TC, Bp, 4H) f32 precomputed x@W_ih+b, backward, chunk nc-1-ci
    whh*_ref: (H, 4H)      bf16 recurrent weights (i|f|g|o)
    outf_ref: (TC, Bp, H)  bf16 per-step forward hiddens  (chunk ci)
    outb_ref: (TC, Bp, H)  bf16 per-step backward hiddens (chunk nc-1-ci)
    hf,cf,hb,cb: (Bp, H)   f32 VMEM scratch carrying recurrent state.
    """
    ci = pl.program_id(0)
    nc = pl.num_programs(0)
    H = hidden

    @pl.when(ci == 0)
    def _():
        hf[...] = jnp.zeros_like(hf)
        cf[...] = jnp.zeros_like(cf)
        hb[...] = jnp.zeros_like(hb)
        cb[...] = jnp.zeros_like(cb)

    lens = len_ref[...]                       # (Bp, 1) int32

    def step(j, carry):
        # ----- forward direction: global time t_f = ci*tc + j --------------
        t_f = ci * tc + j
        gates_f = gxf_ref[j] + jnp.dot(hf[...].astype(jnp.bfloat16),
                                       whhf_ref[...],
                                       preferred_element_type=jnp.float32)
        i_f = jax.nn.sigmoid(gates_f[:, 0 * H:1 * H])
        f_f = jax.nn.sigmoid(gates_f[:, 1 * H:2 * H])
        g_f = jnp.tanh(gates_f[:, 2 * H:3 * H])
        o_f = jax.nn.sigmoid(gates_f[:, 3 * H:4 * H])
        c_new_f = f_f * cf[...] + i_f * g_f
        h_new_f = o_f * jnp.tanh(c_new_f)
        valid_f = t_f < lens                   # (Bp, 1) bool
        hf[...] = jnp.where(valid_f, h_new_f, hf[...])
        cf[...] = jnp.where(valid_f, c_new_f, cf[...])
        # padded positions emit zeros (matches pad_packed_sequence)
        outf_ref[j] = jnp.where(valid_f, h_new_f, 0.0).astype(outf_ref.dtype)

        # ----- backward direction: local jl = tc-1-j in chunk nc-1-ci -------
        jl = tc - 1 - j
        t_b = (nc - 1 - ci) * tc + jl
        gates_b = gxb_ref[jl] + jnp.dot(hb[...].astype(jnp.bfloat16),
                                        whhb_ref[...],
                                        preferred_element_type=jnp.float32)
        i_b = jax.nn.sigmoid(gates_b[:, 0 * H:1 * H])
        f_b = jax.nn.sigmoid(gates_b[:, 1 * H:2 * H])
        g_b = jnp.tanh(gates_b[:, 2 * H:3 * H])
        o_b = jax.nn.sigmoid(gates_b[:, 3 * H:4 * H])
        c_new_b = f_b * cb[...] + i_b * g_b
        h_new_b = o_b * jnp.tanh(c_new_b)
        valid_b = t_b < lens
        hb[...] = jnp.where(valid_b, h_new_b, hb[...])
        cb[...] = jnp.where(valid_b, c_new_b, cb[...])
        outb_ref[jl] = jnp.where(valid_b, h_new_b, 0.0).astype(outb_ref.dtype)
        return carry

    lax.fori_loop(0, tc, step, 0, unroll=True)


def _bwd_final_kernel(len_ref, gxb_ref, whhb_ref, hn_ref, hb, cb, *, tc, hidden):
    """Backward-only last layer; emits only the final (Bp, H) hidden (hn)."""
    ci = pl.program_id(0)
    nc = pl.num_programs(0)
    H = hidden

    @pl.when(ci == 0)
    def _():
        hb[...] = jnp.zeros_like(hb)
        cb[...] = jnp.zeros_like(cb)

    lens = len_ref[...]                       # (Bp, 1) int32

    def step(j, carry):
        jl = tc - 1 - j
        t_b = (nc - 1 - ci) * tc + jl
        gates = gxb_ref[jl] + jnp.dot(hb[...].astype(jnp.bfloat16),
                                      whhb_ref[...],
                                      preferred_element_type=jnp.float32)
        i_g = jax.nn.sigmoid(gates[:, 0 * H:1 * H])
        f_g = jax.nn.sigmoid(gates[:, 1 * H:2 * H])
        g_g = jnp.tanh(gates[:, 2 * H:3 * H])
        o_g = jax.nn.sigmoid(gates[:, 3 * H:4 * H])
        c_new = f_g * cb[...] + i_g * g_g
        h_new = o_g * jnp.tanh(c_new)
        valid = t_b < lens
        hb[...] = jnp.where(valid, h_new, hb[...])
        cb[...] = jnp.where(valid, c_new, cb[...])
        return carry

    lax.fori_loop(0, tc, step, 0, unroll=True)
    # constant out index -> hn block stays resident; final value written back
    hn_ref[...] = hb[...]


# --------------------------------------------------------------------------
# pallas_call wrappers
# --------------------------------------------------------------------------
def _bilstm_layer(gx_fw, gx_bw, whh_fw_b16, whh_bw_b16, lens_col, *, tc):
    Tp, Bp, G = gx_fw.shape
    H = G // 4
    nc = Tp // tc
    kernel = functools.partial(_bilstm_chunk_kernel, tc=tc, hidden=H)

    grid_spec = pltpu.PrefetchScalarGridSpec(
        num_scalar_prefetch=0,
        grid=(nc,),
        in_specs=[
            pl.BlockSpec((Bp, 1), lambda c: (0, 0)),                      # lengths
            pl.BlockSpec((tc, Bp, G), lambda c: (c, 0, 0)),               # gx fwd
            pl.BlockSpec((tc, Bp, G), lambda c, nc=nc: (nc - 1 - c, 0, 0)),  # gx bwd
            pl.BlockSpec((H, G), lambda c: (0, 0)),                       # W_hh fwd
            pl.BlockSpec((H, G), lambda c: (0, 0)),                       # W_hh bwd
        ],
        out_specs=[
            pl.BlockSpec((tc, Bp, H), lambda c: (c, 0, 0)),
            pl.BlockSpec((tc, Bp, H), lambda c, nc=nc: (nc - 1 - c, 0, 0)),
        ],
        scratch_shapes=[pltpu.VMEM((Bp, H), jnp.float32)] * 4,
    )
    return pl.pallas_call(
        kernel,
        out_shape=(jax.ShapeDtypeStruct((Tp, Bp, H), jnp.bfloat16),
                   jax.ShapeDtypeStruct((Tp, Bp, H), jnp.bfloat16)),
        grid_spec=grid_spec,
        compiler_params=pltpu.CompilerParams(
            dimension_semantics=("arbitrary",)),
    )(lens_col, gx_fw, gx_bw, whh_fw_b16, whh_bw_b16)


def _bwd_final_layer(gx_bw, whh_bw_b16, lens_col, *, tc):
    Tp, Bp, G = gx_bw.shape
    H = G // 4
    nc = Tp // tc
    kernel = functools.partial(_bwd_final_kernel, tc=tc, hidden=H)

    grid_spec = pltpu.PrefetchScalarGridSpec(
        num_scalar_prefetch=0,
        grid=(nc,),
        in_specs=[
            pl.BlockSpec((Bp, 1), lambda c: (0, 0)),
            pl.BlockSpec((tc, Bp, G), lambda c, nc=nc: (nc - 1 - c, 0, 0)),
            pl.BlockSpec((H, G), lambda c: (0, 0)),
        ],
        out_specs=pl.BlockSpec((Bp, H), lambda c: (0, 0)),
        scratch_shapes=[pltpu.VMEM((Bp, H), jnp.float32)] * 2,
    )
    return pl.pallas_call(
        kernel,
        out_shape=jax.ShapeDtypeStruct((Bp, H), jnp.float32),
        grid_spec=grid_spec,
        compiler_params=pltpu.CompilerParams(
            dimension_semantics=("arbitrary",)),
    )(lens_col, gx_bw, whh_bw_b16)


# --------------------------------------------------------------------------
# Hoisted input projection (one big MXU matmul over all time steps)
# --------------------------------------------------------------------------
def _input_projection(inputs, wih_t_b16, bias_f32):
    """sum_i inputs[i] @ W_ih[rows for i] + bias, over all T*B rows at once.

    inputs: list of (Tp, Bp, d_i) bf16 arrays whose (conceptual) concat along
    the last dim is the layer input. Splitting W_ih avoids materializing the
    concat in HBM. Returns (Tp, Bp, 4H) float32.
    """
    Tp, Bp = inputs[0].shape[0], inputs[0].shape[1]
    G = wih_t_b16.shape[1]
    acc = jnp.zeros((Tp * Bp, G), jnp.float32)
    off = 0
    for inp in inputs:
        d = inp.shape[-1]
        acc = acc + jnp.dot(inp.reshape(Tp * Bp, d), wih_t_b16[off:off + d],
                            preferred_element_type=jnp.float32)
        off += d
    acc = acc + bias_f32.astype(jnp.float32)
    return acc.reshape(Tp, Bp, G)


# --------------------------------------------------------------------------
# Forward pass (mirrors BLSTMEncoder.forward semantics)
# --------------------------------------------------------------------------
def blstm_encoder_forward(x, lengths, params, *, time_chunk=8):
    """x: (B, T, D) batch-first. Returns hn[-1] (backward hidden of the last
    layer) in descending-length sorted batch order, like the PyTorch module."""
    num_layers = len(params)

    # lengths.sort(0, descending=True); x = x[sort_idx]
    sort_idx = jnp.argsort(-lengths)
    lengths_s = lengths[sort_idx].astype(jnp.int32)
    x_s = x[sort_idx]

    B, T, D = x_s.shape
    H = params[0][0][1].shape[0]                      # whh_t is (H, 4H)

    Bp = ((B + 7) // 8) * 8                           # sublane-pad batch
    tc = max(1, min(time_chunk, T))                   # time-chunk size
    Tp = ((T + tc - 1) // tc) * tc                    # pad T to chunk multiple

    # Padding is masked out via lengths (padded rows get length 0).
    x_p = jnp.zeros((Bp, Tp, D), x_s.dtype).at[:B, :T].set(x_s)
    lens_p = jnp.zeros((Bp,), jnp.int32).at[:B].set(lengths_s)
    lens_col = lens_p.reshape(Bp, 1)

    x_tm = jnp.transpose(x_p, (1, 0, 2)).astype(jnp.bfloat16)   # (Tp, Bp, D)

    layer_inputs = [x_tm]
    hn = None
    for l, ((wih_fw, whh_fw, b_fw), (wih_bw, whh_bw, b_bw)) in enumerate(params):
        is_last = (l == num_layers - 1)
        # hoisted input projection for the backward direction
        gx_bw = _input_projection(layer_inputs, wih_bw.astype(jnp.bfloat16), b_bw)
        if is_last:
            # last layer: forward direction is dead work for hn[-1] -> skip it
            hn = _bwd_final_layer(gx_bw, whh_bw.astype(jnp.bfloat16),
                                  lens_col, tc=tc)
        else:
            gx_fw = _input_projection(layer_inputs,
                                      wih_fw.astype(jnp.bfloat16), b_fw)
            out_fw, out_bw = _bilstm_layer(gx_fw, gx_bw,
                                           whh_fw.astype(jnp.bfloat16),
                                           whh_bw.astype(jnp.bfloat16),
                                           lens_col, tc=tc)
            # no concat: next layer's projection consumes the two halves
            layer_inputs = [out_fw, out_bw]
        # TODO(synk): inter-layer dropout (drop_prob > 0) not implemented;
        # module default drop_prob=0 is what this reproduces.

    return hn[:B]                                     # (B, H) float32


# --------------------------------------------------------------------------
# Pure-JAX reference with identical numerics (bf16 matmuls, f32 accumulate)
# --------------------------------------------------------------------------
def _lstm_dir_ref(gates_x, lens_col, whh_b16, *, reverse):
    Tp, Bp, G = gates_x.shape
    H = G // 4
    ts = jnp.arange(Tp, dtype=jnp.int32)
    gx, ts = (gates_x[::-1], ts[::-1]) if reverse else (gates_x, ts)

    def step(carry, inp):
        h, c = carry
        gx_t, t = inp
        gates = gx_t + jnp.dot(h.astype(jnp.bfloat16), whh_b16,
                               preferred_element_type=jnp.float32)
        i_g = jax.nn.sigmoid(gates[:, :H])
        f_g = jax.nn.sigmoid(gates[:, H:2 * H])
        g_g = jnp.tanh(gates[:, 2 * H:3 * H])
        o_g = jax.nn.sigmoid(gates[:, 3 * H:])
        c_new = f_g * c + i_g * g_g
        h_new = o_g * jnp.tanh(c_new)
        valid = t < lens_col
        h = jnp.where(valid, h_new, h)
        c = jnp.where(valid, c_new, c)
        out = jnp.where(valid, h_new, 0.0)
        return (h, c), out

    init = (jnp.zeros((Bp, H), jnp.float32), jnp.zeros((Bp, H), jnp.float32))
    (h, _), outs = lax.scan(step, init, (gx, ts))
    if reverse:
        outs = outs[::-1]
    return outs, h


def blstm_encoder_ref(x, lengths, params, *, time_chunk=8):
    num_layers = len(params)
    sort_idx = jnp.argsort(-lengths)
    lengths_s = lengths[sort_idx].astype(jnp.int32)
    x_s = x[sort_idx]
    B, T, D = x_s.shape
    Bp = ((B + 7) // 8) * 8
    tc = max(1, min(time_chunk, T))
    Tp = ((T + tc - 1) // tc) * tc
    x_p = jnp.zeros((Bp, Tp, D), x_s.dtype).at[:B, :T].set(x_s)
    lens_p = jnp.zeros((Bp,), jnp.int32).at[:B].set(lengths_s)
    lens_col = lens_p.reshape(Bp, 1)
    x_tm = jnp.transpose(x_p, (1, 0, 2)).astype(jnp.bfloat16)

    layer_inputs = [x_tm]
    hn = None
    for l, ((wih_fw, whh_fw, b_fw), (wih_bw, whh_bw, b_bw)) in enumerate(params):
        is_last = (l == num_layers - 1)
        gx_bw = _input_projection(layer_inputs, wih_bw.astype(jnp.bfloat16), b_bw)
        if is_last:
            _, hn = _lstm_dir_ref(gx_bw, lens_col, whh_bw.astype(jnp.bfloat16),
                                  reverse=True)
        else:
            gx_fw = _input_projection(layer_inputs,
                                      wih_fw.astype(jnp.bfloat16), b_fw)
            out_fw, _ = _lstm_dir_ref(gx_fw, lens_col,
                                      whh_fw.astype(jnp.bfloat16), reverse=False)
            out_bw, _ = _lstm_dir_ref(gx_bw, lens_col,
                                      whh_bw.astype(jnp.bfloat16), reverse=True)
            layer_inputs = [out_fw.astype(jnp.bfloat16),
                            out_bw.astype(jnp.bfloat16)]
    return hn[:B]


# --------------------------------------------------------------------------
# Parameters (PyTorch-like uniform(-1/sqrt(H), 1/sqrt(H)) init, gate order i|f|g|o)
# --------------------------------------------------------------------------
def init_params(key, input_size, hidden_size, num_layers):
    """Each layer: ((W_ih^T (D_l,4H), W_hh^T (H,4H), bias (1,4H)) fwd, same bwd)."""
    bound = 1.0 / (hidden_size ** 0.5)
    params = []
    for l in range(num_layers):
        d_in = input_size if l == 0 else 2 * hidden_size
        layer = []
        for _direction in range(2):
            key, k1, k2, k3, k4 = jax.random.split(key, 5)
            wih = jax.random.uniform(k1, (4 * hidden_size, d_in),
                                     minval=-bound, maxval=bound, dtype=jnp.float32)
            whh = jax.random.uniform(k2, (4 * hidden_size, hidden_size),
                                     minval=-bound, maxval=bound, dtype=jnp.float32)
            bih = jax.random.uniform(k3, (4 * hidden_size,),
                                     minval=-bound, maxval=bound, dtype=jnp.float32)
            bhh = jax.random.uniform(k4, (4 * hidden_size,),
                                     minval=-bound, maxval=bound, dtype=jnp.float32)
            layer.append((wih.T, whh.T, (bih + bhh)[None, :]))
        params.append(tuple(layer))
    return params


if __name__ == "__main__":
    INPUT_SIZE = 16
    HIDDEN_SIZE = 32
    NUM_LAYERS = 2
    B, T = 4, 10
    TIME_CHUNK = 4          # > 1 chunk so state carry across grid steps is exercised

    key = jax.random.PRNGKey(0)
    k_x, k_p = jax.random.split(key)
    x = jax.random.normal(k_x, (B, T, INPUT_SIZE), dtype=jnp.float32)
    lengths = jnp.array([7, 10, 3, 9], dtype=jnp.int32)

    params = init_params(k_p, INPUT_SIZE, HIDDEN_SIZE, NUM_LAYERS)

    hn_last = blstm_encoder_forward(x, lengths, params, time_chunk=TIME_CHUNK)
    hn_last = jax.block_until_ready(hn_last)
    assert hn_last.shape == (B, HIDDEN_SIZE)

    ref = jax.block_until_ready(
        blstm_encoder_ref(x, lengths, params, time_chunk=TIME_CHUNK))
    max_err = jnp.max(jnp.abs(hn_last - ref))
    assert jnp.allclose(hn_last, ref, atol=5e-3, rtol=5e-3), (
        f"max abs err {max_err}")

    print("KERNEL_OK")
</pallas_src>

<mosaic_0001>
module attributes {stable_mosaic.version = 11 : i64} {
  func.func @_bilstm_chunk_kernel(%arg0: i32, %arg1: memref<8x1xi32, #tpu.memory_space<vmem>>, %arg2: memref<4x8x128xf32, #tpu.memory_space<vmem>>, %arg3: memref<4x8x128xf32, #tpu.memory_space<vmem>>, %arg4: memref<32x128xbf16, #tpu.memory_space<vmem>>, %arg5: memref<32x128xbf16, #tpu.memory_space<vmem>>, %arg6: memref<4x8x32xbf16, #tpu.memory_space<vmem>>, %arg7: memref<4x8x32xbf16, #tpu.memory_space<vmem>>, %arg8: memref<8x32xf32, #tpu.memory_space<vmem>>, %arg9: memref<8x32xf32, #tpu.memory_space<vmem>>, %arg10: memref<8x32xf32, #tpu.memory_space<vmem>>, %arg11: memref<8x32xf32, #tpu.memory_space<vmem>>) attributes {dimension_semantics = [#tpu.dimension_semantics<arbitrary>], iteration_bounds = array<i64: 3>, scalar_prefetch = 0 : i64, scratch_operands = 4 : i64, tpu.core_type = #tpu.core_type<tc>, window_params = [{pipeline_mode = #tpu.pipeline_mode<synchronous>, transform_indices = @transform_0, window_bounds = array<i64: 8, 1>}, {transform_indices = @transform_1, window_bounds = array<i64: 4, 8, 128>}, {transform_indices = @transform_2, window_bounds = array<i64: 4, 8, 128>}, {pipeline_mode = #tpu.pipeline_mode<synchronous>, transform_indices = @transform_3, window_bounds = array<i64: 32, 128>}, {pipeline_mode = #tpu.pipeline_mode<synchronous>, transform_indices = @transform_4, window_bounds = array<i64: 32, 128>}, {transform_indices = @transform_5, window_bounds = array<i64: 4, 8, 32>}, {transform_indices = @transform_6, window_bounds = array<i64: 4, 8, 32>}]} {
    %c0_i32 = arith.constant 0 : i32
    %0 = arith.cmpi eq, %arg0, %c0_i32 : i32
    %1 = arith.extui %0 : i1 to i32
    %c0_i32_0 = arith.constant 0 : i32
    %2 = arith.cmpi ne, %1, %c0_i32_0 : i32
    scf.if %2 {
      %cst_202 = arith.constant 0.000000e+00 : f32
      %468 = vector.broadcast %cst_202 : f32 to vector<8x32xf32>
      %c0_203 = arith.constant 0 : index
      %c0_204 = arith.constant 0 : index
      %469 = vector.load %arg8[%c0_203, %c0_204] : memref<8x32xf32, #tpu.memory_space<vmem>>, vector<8x32xf32>
      tpu.vector_store %arg8[%c0_203, %c0_204], %468 {strides = array<i32>} : memref<8x32xf32, #tpu.memory_space<vmem>>, vector<8x32xf32>,
      %cst_205 = arith.constant 0.000000e+00 : f32
      %470 = vector.broadcast %cst_205 : f32 to vector<8x32xf32>
      %c0_206 = arith.constant 0 : index
      %c0_207 = arith.constant 0 : index
      %471 = vector.load %arg9[%c0_206, %c0_207] : memref<8x32xf32, #tpu.memory_space<vmem>>, vector<8x32xf32>
      tpu.vector_store %arg9[%c0_206, %c0_207], %470 {strides = array<i32>} : memref<8x32xf32, #tpu.memory_space<vmem>>, vector<8x32xf32>,
      %cst_208 = arith.constant 0.000000e+00 : f32
      %472 = vector.broadcast %cst_208 : f32 to vector<8x32xf32>
      %c0_209 = arith.constant 0 : index
      %c0_210 = arith.constant 0 : index
      %473 = vector.load %arg10[%c0_209, %c0_210] : memref<8x32xf32, #tpu.memory_space<vmem>>, vector<8x32xf32>
      tpu.vector_store %arg10[%c0_209, %c0_210], %472 {strides = array<i32>} : memref<8x32xf32, #tpu.memory_space<vmem>>, vector<8x32xf32>,
      %cst_211 = arith.constant 0.000000e+00 : f32
      %474 = vector.broadcast %cst_211 : f32 to vector<8x32xf32>
      %c0_212 = arith.constant 0 : index
      %c0_213 = arith.constant 0 : index
      %475 = vector.load %arg11[%c0_212, %c0_213] : memref<8x32xf32, #tpu.memory_space<vmem>>, vector<8x32xf32>
      tpu.vector_store %arg11[%c0_212, %c0_213], %474 {strides = array<i32>} : memref<8x32xf32, #tpu.memory_space<vmem>>, vector<8x32xf32>,
    } else {
    }
    %c0 = arith.constant 0 : index
    %c0_1 = arith.constant 0 : index
    %3 = vector.load %arg1[%c0, %c0_1] : memref<8x1xi32, #tpu.memory_space<vmem>>, vector<8x1xi32>
    %c0_i32_2 = arith.constant 0 : i32
    %c4_i32 = arith.constant 4 : i32
    %4 = arith.muli %arg0, %c4_i32 : i32
    %5 = arith.addi %4, %c0_i32_2 : i32
    %6 = arith.index_cast %c0_i32_2 : i32 to index
    %c0_3 = arith.constant 0 : index
    %c0_4 = arith.constant 0 : index
    %7 = vector.load %arg2[%6, %c0_3, %c0_4] : memref<4x8x128xf32, #tpu.memory_space<vmem>>, vector<1x8x128xf32>
    %8 = vector.shape_cast %7 : vector<1x8x128xf32> to vector<8x128xf32>
    %c0_5 = arith.constant 0 : index
    %c0_6 = arith.constant 0 : index
    %9 = vector.load %arg8[%c0_5, %c0_6] : memref<8x32xf32, #tpu.memory_space<vmem>>, vector<8x32xf32>
    %10 = arith.truncf %9 : vector<8x32xf32> to vector<8x32xbf16>
    %c0_7 = arith.constant 0 : index
    %c0_8 = arith.constant 0 : index
    %11 = vector.load %arg4[%c0_7, %c0_8] : memref<32x128xbf16, #tpu.memory_space<vmem>>, vector<32x128xbf16>
    %cst = arith.constant dense<0.000000e+00> : vector<8x128xf32>
    %12 = tpu.matmul %10, %11, %cst {dimension_numbers = #tpu.dot_dimension_numbers<[1], [0], [0], [1], [0, 0, 1, 1], [], []>} : vector<8x32xbf16>, vector<32x128xbf16>, vector<8x128xf32> -> vector<8x128xf32>
    %13 = arith.addf %8, %12 : vector<8x128xf32>
    %14 = vector.extract_strided_slice %13 {offsets = [0, 0], sizes = [8, 32], strides = [1, 1]} : vector<8x128xf32> to vector<8x32xf32>
    %15 = arith.negf %14 : vector<8x32xf32>
    %16 = math.exp %15 : vector<8x32xf32>
    %cst_9 = arith.constant 1.000000e+00 : f32
    %17 = vector.broadcast %cst_9 : f32 to vector<8x32xf32>
    %18 = arith.addf %17, %16 : vector<8x32xf32>
    %19 = arith.divf %17, %18 : vector<8x32xf32>
    %20 = vector.extract_strided_slice %13 {offsets = [0, 32], sizes = [8, 32], strides = [1, 1]} : vector<8x128xf32> to vector<8x32xf32>
    %21 = arith.negf %20 : vector<8x32xf32>
    %22 = math.exp %21 : vector<8x32xf32>
    %cst_10 = arith.constant 1.000000e+00 : f32
    %23 = vector.broadcast %cst_10 : f32 to vector<8x32xf32>
    %24 = arith.addf %23, %22 : vector<8x32xf32>
    %25 = arith.divf %23, %24 : vector<8x32xf32>
    %26 = vector.extract_strided_slice %13 {offsets = [0, 64], sizes = [8, 32], strides = [1, 1]} : vector<8x128xf32> to vector<8x32xf32>
    %27 = math.tanh %26 : vector<8x32xf32>
    %28 = vector.extract_strided_slice %13 {offsets = [0, 96], sizes = [8, 32], strides = [1, 1]} : vector<8x128xf32> to vector<8x32xf32>
    %29 = arith.negf %28 : vector<8x32xf32>
    %30 = math.exp %29 : vector<8x32xf32>
    %cst_11 = arith.constant 1.000000e+00 : f32
    %31 = vector.broadcast %cst_11 : f32 to vector<8x32xf32>
    %32 = arith.addf %31, %30 : vector<8x32xf32>
    %33 = arith.divf %31, %32 : vector<8x32xf32>
    %c0_12 = arith.constant 0 : index
    %c0_13 = arith.constant 0 : index
    %34 = vector.load %arg9[%c0_12, %c0_13] : memref<8x32xf32, #tpu.memory_space<vmem>>, vector<8x32xf32>
    %35 = arith.mulf %25, %34 : vector<8x32xf32>
    %36 = arith.mulf %19, %27 : vector<8x32xf32>
    %37 = arith.addf %35, %36 : vector<8x32xf32>
    %38 = math.tanh %37 : vector<8x32xf32>
    %39 = arith.mulf %33, %38 : vector<8x32xf32>
    %40 = vector.broadcast %5 : i32 to vector<8x1xi32>
    %41 = arith.cmpi slt, %40, %3 : vector<8x1xi32>
    %c0_14 = arith.constant 0 : index
    %c0_15 = arith.constant 0 : index
    %42 = vector.load %arg8[%c0_14, %c0_15] : memref<8x32xf32, #tpu.memory_space<vmem>>, vector<8x32xf32>
    %43 = vector.shape_cast %41 : vector<8x1xi1> to vector<8x1xi1>
    %44 = vector.broadcast %43 : vector<8x1xi1> to vector<8x32xi1>
    %45 = arith.select %44, %39, %42 : vector<8x32xi1>, vector<8x32xf32>
    %c0_16 = arith.constant 0 : index
    %c0_17 = arith.constant 0 : index
    %46 = vector.load %arg8[%c0_16, %c0_17] : memref<8x32xf32, #tpu.memory_space<vmem>>, vector<8x32xf32>
    tpu.vector_store %arg8[%c0_16, %c0_17], %45 {strides = array<i32>} : memref<8x32xf32, #tpu.memory_space<vmem>>, vector<8x32xf32>,
    %c0_18 = arith.constant 0 : index
    %c0_19 = arith.constant 0 : index
    %47 = vector.load %arg9[%c0_18, %c0_19] : memref<8x32xf32, #tpu.memory_space<vmem>>, vector<8x32xf32>
    %48 = vector.shape_cast %41 : vector<8x1xi1> to vector<8x1xi1>
    %49 = vector.broadcast %48 : vector<8x1xi1> to vector<8x32xi1>
    %50 = arith.select %49, %37, %47 : vector<8x32xi1>, vector<8x32xf32>
    %c0_20 = arith.constant 0 : index
    %c0_21 = arith.constant 0 : index
    %51 = vector.load %arg9[%c0_20, %c0_21] : memref<8x32xf32, #tpu.memory_space<vmem>>, vector<8x32xf32>
    tpu.vector_store %arg9[%c0_20, %c0_21], %50 {strides = array<i32>} : memref<8x32xf32, #tpu.memory_space<vmem>>, vector<8x32xf32>,
    %cst_22 = arith.constant 0.000000e+00 : f32
    %52 = vector.shape_cast %41 : vector<8x1xi1> to vector<8x1xi1>
    %53 = vector.broadcast %52 : vector<8x1xi1> to vector<8x32xi1>
    %54 = vector.broadcast %cst_22 : f32 to vector<8x32xf32>
    %55 = arith.select %53, %39, %54 : vector<8x32xi1>, vector<8x32xf32>
    %56 = arith.truncf %55 : vector<8x32xf32> to vector<8x32xbf16>
    %57 = arith.index_cast %c0_i32_2 : i32 to index
    %c0_23 = arith.constant 0 : index
    %c0_24 = arith.constant 0 : index
    %58 = vector.load %arg6[%57, %c0_23, %c0_24] : memref<4x8x32xbf16, #tpu.memory_space<vmem>>, vector<1x8x32xbf16>
    %59 = vector.shape_cast %58 : vector<1x8x32xbf16> to vector<8x32xbf16>
    %60 = vector.shape_cast %56 : vector<8x32xbf16> to vector<1x8x32xbf16>
    tpu.vector_store %arg6[%57, %c0_23, %c0_24], %60 {strides = array<i32>} : memref<4x8x32xbf16, #tpu.memory_space<vmem>>, vector<1x8x32xbf16>,
    %c3_i32 = arith.constant 3 : i32
    %61 = arith.subi %c3_i32, %c0_i32_2 : i32
    %c2_i32 = arith.constant 2 : i32
    %62 = arith.subi %c2_i32, %arg0 : i32
    %c4_i32_25 = arith.constant 4 : i32
    %63 = arith.muli %62, %c4_i32_25 : i32
    %64 = arith.addi %63, %61 : i32
    %65 = arith.index_cast %61 : i32 to index
    %c0_26 = arith.constant 0 : index
    %c0_27 = arith.constant 0 : index
    %66 = vector.load %arg3[%65, %c0_26, %c0_27] : memref<4x8x128xf32, #tpu.memory_space<vmem>>, vector<1x8x128xf32>
    %67 = vector.shape_cast %66 : vector<1x8x128xf32> to vector<8x128xf32>
    %c0_28 = arith.constant 0 : index
    %c0_29 = arith.constant 0 : index
    %68 = vector.load %arg10[%c0_28, %c0_29] : memref<8x32xf32, #tpu.memory_space<vmem>>, vector<8x32xf32>
    %69 = arith.truncf %68 : vector<8x32xf32> to vector<8x32xbf16>
    %c0_30 = arith.constant 0 : index
    %c0_31 = arith.constant 0 : index
    %70 = vector.load %arg5[%c0_30, %c0_31] : memref<32x128xbf16, #tpu.memory_space<vmem>>, vector<32x128xbf16>
    %cst_32 = arith.constant dense<0.000000e+00> : vector<8x128xf32>
    %71 = tpu.matmul %69, %70, %cst_32 {dimension_numbers = #tpu.dot_dimension_numbers<[1], [0], [0], [1], [0, 0, 1, 1], [], []>} : vector<8x32xbf16>, vector<32x128xbf16>, vector<8x128xf32> -> vector<8x128xf32>
    %72 = arith.addf %67, %71 : vector<8x128xf32>
    %73 = vector.extract_strided_slice %72 {offsets = [0, 0], sizes = [8, 32], strides = [1, 1]} : vector<8x128xf32> to vector<8x32xf32>
    %74 = arith.negf %73 : vector<8x32xf32>
    %75 = math.exp %74 : vector<8x32xf32>
    %cst_33 = arith.constant 1.000000e+00 : f32
    %76 = vector.broadcast %cst_33 : f32 to vector<8x32xf32>
    %77 = arith.addf %76, %75 : vector<8x32xf32>
    %78 = arith.divf %76, %77 : vector<8x32xf32>
    %79 = vector.extract_strided_slice %72 {offsets = [0, 32], sizes = [8, 32], strides = [1, 1]} : vector<8x128xf32> to vector<8x32xf32>
    %80 = arith.negf %79 : vector<8x32xf32>
    %81 = math.exp %80 : vector<8x32xf32>
    %cst_34 = arith.constant 1.000000e+00 : f32
    %82 = vector.broadcast %cst_34 : f32 to vector<8x32xf32>
    %83 = arith.addf %82, %81 : vector<8x32xf32>
    %84 = arith.divf %82, %83 : vector<8x32xf32>
    %85 = vector.extract_strided_slice %72 {offsets = [0, 64], sizes = [8, 32], strides = [1, 1]} : vector<8x128xf32> to vector<8x32xf32>
    %86 = math.tanh %85 : vector<8x32xf32>
    %87 = vector.extract_strided_slice %72 {offsets = [0, 96], sizes = [8, 32], strides = [1, 1]} : vector<8x128xf32> to vector<8x32xf32>
    %88 = arith.negf %87 : vector<8x32xf32>
    %89 = math.exp %88 : vector<8x32xf32>
    %cst_35 = arith.constant 1.000000e+00 : f32
    %90 = vector.broadcast %cst_35 : f32 to vector<8x32xf32>
    %91 = arith.addf %90, %89 : vector<8x32xf32>
    %92 = arith.divf %90, %91 : vector<8x32xf32>
    %c0_36 = arith.constant 0 : index
    %c0_37 = arith.constant 0 : index
    %93 = vector.load %arg11[%c0_36, %c0_37] : memref<8x32xf32, #tpu.memory_space<vmem>>, vector<8x32xf32>
    %94 = arith.mulf %84, %93 : vector<8x32xf32>
    %95 = arith.mulf %78, %86 : vector<8x32xf32>
    %96 = arith.addf %94, %95 : vector<8x32xf32>
    %97 = math.tanh %96 : vector<8x32xf32>
    %98 = arith.mulf %92, %97 : vector<8x32xf32>
    %99 = vector.broadcast %64 : i32 to vector<8x1xi32>
    %100 = arith.cmpi slt, %99, %3 : vector<8x1xi32>
    %c0_38 = arith.constant 0 : index
    %c0_39 = arith.constant 0 : index
    %101 = vector.load %arg10[%c0_38, %c0_39] : memref<8x32xf32, #tpu.memory_space<vmem>>, vector<8x32xf32>
    %102 = vector.shape_cast %100 : vector<8x1xi1> to vector<8x1xi1>
    %103 = vector.broadcast %102 : vector<8x1xi1> to vector<8x32xi1>
    %104 = arith.select %103, %98, %101 : vector<8x32xi1>, vector<8x32xf32>
    %c0_40 = arith.constant 0 : index
    %c0_41 = arith.constant 0 : index
    %105 = vector.load %arg10[%c0_40, %c0_41] : memref<8x32xf32, #tpu.memory_space<vmem>>, vector<8x32xf32>
    tpu.vector_store %arg10[%c0_40, %c0_41], %104 {strides = array<i32>} : memref<8x32xf32, #tpu.memory_space<vmem>>, vector<8x32xf32>,
    %c0_42 = arith.constant 0 : index
    %c0_43 = arith.constant 0 : index
    %106 = vector.load %arg11[%c0_42, %c0_43] : memref<8x32xf32, #tpu.memory_space<vmem>>, vector<8x32xf32>
    %107 = vector.shape_cast %100 : vector<8x1xi1> to vector<8x1xi1>
    %108 = vector.broadcast %107 : vector<8x1xi1> to vector<8x32xi1>
    %109 = arith.select %108, %96, %106 : vector<8x32xi1>, vector<8x32xf32>
    %c0_44 = arith.constant 0 : index
    %c0_45 = arith.constant 0 : index
    %110 = vector.load %arg11[%c0_44, %c0_45] : memref<8x32xf32, #tpu.memory_space<vmem>>, vector<8x32xf32>
    tpu.vector_store %arg11[%c0_44, %c0_45], %109 {strides = array<i32>} : memref<8x32xf32, #tpu.memory_space<vmem>>, vector<8x32xf32>,
    %cst_46 = arith.constant 0.000000e+00 : f32
    %111 = vector.shape_cast %100 : vector<8x1xi1> to vector<8x1xi1>
    %112 = vector.broadcast %111 : vector<8x1xi1> to vector<8x32xi1>
    %113 = vector.broadcast %cst_46 : f32 to vector<8x32xf32>
    %114 = arith.select %112, %98, %113 : vector<8x32xi1>, vector<8x32xf32>
    %115 = arith.truncf %114 : vector<8x32xf32> to vector<8x32xbf16>
    %116 = arith.index_cast %61 : i32 to index
    %c0_47 = arith.constant 0 : index
    %c0_48 = arith.constant 0 : index
    %117 = vector.load %arg7[%116, %c0_47, %c0_48] : memref<4x8x32xbf16, #tpu.memory_space<vmem>>, vector<1x8x32xbf16>
    %118 = vector.shape_cast %117 : vector<1x8x32xbf16> to vector<8x32xbf16>
    %119 = vector.shape_cast %115 : vector<8x32xbf16> to vector<1x8x32xbf16>
    tpu.vector_store %arg7[%116, %c0_47, %c0_48], %119 {strides = array<i32>} : memref<4x8x32xbf16, #tpu.memory_space<vmem>>, vector<1x8x32xbf16>,
    %c1_i32 = arith.constant 1 : i32
    %c4_i32_49 = arith.constant 4 : i32
    %120 = arith.muli %arg0, %c4_i32_49 : i32
    %121 = arith.addi %120, %c1_i32 : i32
    %122 = arith.index_cast %c1_i32 : i32 to index
    %c0_50 = arith.constant 0 : index
    %c0_51 = arith.constant 0 : index
    %123 = vector.load %arg2[%122, %c0_50, %c0_51] : memref<4x8x128xf32, #tpu.memory_space<vmem>>, vector<1x8x128xf32>
    %124 = vector.shape_cast %123 : vector<1x8x128xf32> to vector<8x128xf32>
    %c0_52 = arith.constant 0 : index
    %c0_53 = arith.constant 0 : index
    %125 = vector.load %arg8[%c0_52, %c0_53] : memref<8x32xf32, #tpu.memory_space<vmem>>, vector<8x32xf32>
    %126 = arith.truncf %125 : vector<8x32xf32> to vector<8x32xbf16>
    %c0_54 = arith.constant 0 : index
    %c0_55 = arith.constant 0 : index
    %127 = vector.load %arg4[%c0_54, %c0_55] : memref<32x128xbf16, #tpu.memory_space<vmem>>, vector<32x128xbf16>
    %cst_56 = arith.constant dense<0.000000e+00> : vector<8x128xf32>
    %128 = tpu.matmul %126, %127, %cst_56 {dimension_numbers = #tpu.dot_dimension_numbers<[1], [0], [0], [1], [0, 0, 1, 1], [], []>} : vector<8x32xbf16>, vector<32x128xbf16>, vector<8x128xf32> -> vector<8x128xf32>
    %129 = arith.addf %124, %128 : vector<8x128xf32>
    %130 = vector.extract_strided_slice %129 {offsets = [0, 0], sizes = [8, 32], strides = [1, 1]} : vector<8x128xf32> to vector<8x32xf32>
    %131 = arith.negf %130 : vector<8x32xf32>
    %132 = math.exp %131 : vector<8x32xf32>
    %cst_57 = arith.constant 1.000000e+00 : f32
    %133 = vector.broadcast %cst_57 : f32 to vector<8x32xf32>
    %134 = arith.addf %133, %132 : vector<8x32xf32>
    %135 = arith.divf %133, %134 : vector<8x32xf32>
    %136 = vector.extract_strided_slice %129 {offsets = [0, 32], sizes = [8, 32], strides = [1, 1]} : vector<8x128xf32> to vector<8x32xf32>
    %137 = arith.negf %136 : vector<8x32xf32>
    %138 = math.exp %137 : vector<8x32xf32>
    %cst_58 = arith.constant 1.000000e+00 : f32
    %139 = vector.broadcast %cst_58 : f32 to vector<8x32xf32>
    %140 = arith.addf %139, %138 : vector<8x32xf32>
    %141 = arith.divf %139, %140 : vector<8x32xf32>
    %142 = vector.extract_strided_slice %129 {offsets = [0, 64], sizes = [8, 32], strides = [1, 1]} : vector<8x128xf32> to vector<8x32xf32>
    %143 = math.tanh %142 : vector<8x32xf32>
    %144 = vector.extract_strided_slice %129 {offsets = [0, 96], sizes = [8, 32], strides = [1, 1]} : vector<8x128xf32> to vector<8x32xf32>
    %145 = arith.negf %144 : vector<8x32xf32>
    %146 = math.exp %145 : vector<8x32xf32>
    %cst_59 = arith.constant 1.000000e+00 : f32
    %147 = vector.broadcast %cst_59 : f32 to vector<8x32xf32>
    %148 = arith.addf %147, %146 : vector<8x32xf32>
    %149 = arith.divf %147, %148 : vector<8x32xf32>
    %c0_60 = arith.constant 0 : index
    %c0_61 = arith.constant 0 : index
    %150 = vector.load %arg9[%c0_60, %c0_61] : memref<8x32xf32, #tpu.memory_space<vmem>>, vector<8x32xf32>
    %151 = arith.mulf %141, %150 : vector<8x32xf32>
    %152 = arith.mulf %135, %143 : vector<8x32xf32>
    %153 = arith.addf %151, %152 : vector<8x32xf32>
    %154 = math.tanh %153 : vector<8x32xf32>
    %155 = arith.mulf %149, %154 : vector<8x32xf32>
    %156 = vector.broadcast %121 : i32 to vector<8x1xi32>
    %157 = arith.cmpi slt, %156, %3 : vector<8x1xi32>
    %c0_62 = arith.constant 0 : index
    %c0_63 = arith.constant 0 : index
    %158 = vector.load %arg8[%c0_62, %c0_63] : memref<8x32xf32, #tpu.memory_space<vmem>>, vector<8x32xf32>
    %159 = vector.shape_cast %157 : vector<8x1xi1> to vector<8x1xi1>
    %160 = vector.broadcast %159 : vector<8x1xi1> to vector<8x32xi1>
    %161 = arith.select %160, %155, %158 : vector<8x32xi1>, vector<8x32xf32>
    %c0_64 = arith.constant 0 : index
    %c0_65 = arith.constant 0 : index
    %162 = vector.load %arg8[%c0_64, %c0_65] : memref<8x32xf32, #tpu.memory_space<vmem>>, vector<8x32xf32>
    tpu.vector_store %arg8[%c0_64, %c0_65], %161 {strides = array<i32>} : memref<8x32xf32, #tpu.memory_space<vmem>>, vector<8x32xf32>,
    %c0_66 = arith.constant 0 : index
    %c0_67 = arith.constant 0 : index
    %163 = vector.load %arg9[%c0_66, %c0_67] : memref<8x32xf32, #tpu.memory_space<vmem>>, vector<8x32xf32>
    %164 = vector.shape_cast %157 : vector<8x1xi1> to vector<8x1xi1>
    %165 = vector.broadcast %164 : vector<8x1xi1> to vector<8x32xi1>
    %166 = arith.select %165, %153, %163 : vector<8x32xi1>, vector<8x32xf32>
    %c0_68 = arith.constant 0 : index
    %c0_69 = arith.constant 0 : index
    %167 = vector.load %arg9[%c0_68, %c0_69] : memref<8x32xf32, #tpu.memory_space<vmem>>, vector<8x32xf32>
    tpu.vector_store %arg9[%c0_68, %c0_69], %166 {strides = array<i32>} : memref<8x32xf32, #tpu.memory_space<vmem>>, vector<8x32xf32>,
    %cst_70 = arith.constant 0.000000e+00 : f32
    %168 = vector.shape_cast %157 : vector<8x1xi1> to vector<8x1xi1>
    %169 = vector.broadcast %168 : vector<8x1xi1> to vector<8x32xi1>
    %170 = vector.broadcast %cst_70 : f32 to vector<8x32xf32>
    %171 = arith.select %169, %155, %170 : vector<8x32xi1>, vector<8x32xf32>
    %172 = arith.truncf %171 : vector<8x32xf32> to vector<8x32xbf16>
    %173 = arith.index_cast %c1_i32 : i32 to index
    %c0_71 = arith.constant 0 : index
    %c0_72 = arith.constant 0 : index
    %174 = vector.load %arg6[%173, %c0_71, %c0_72] : memref<4x8x32xbf16, #tpu.memory_space<vmem>>, vector<1x8x32xbf16>
    %175 = vector.shape_cast %174 : vector<1x8x32xbf16> to vector<8x32xbf16>
    %176 = vector.shape_cast %172 : vector<8x32xbf16> to vector<1x8x32xbf16>
    tpu.vector_store %arg6[%173, %c0_71, %c0_72], %176 {strides = array<i32>} : memref<4x8x32xbf16, #tpu.memory_space<vmem>>, vector<1x8x32xbf16>,
    %c3_i32_73 = arith.constant 3 : i32
    %177 = arith.subi %c3_i32_73, %c1_i32 : i32
    %c2_i32_74 = arith.constant 2 : i32
    %178 = arith.subi %c2_i32_74, %arg0 : i32
    %c4_i32_75 = arith.constant 4 : i32
    %179 = arith.muli %178, %c4_i32_75 : i32
    %180 = arith.addi %179, %177 : i32
    %181 = arith.index_cast %177 : i32 to index
    %c0_76 = arith.constant 0 : index
    %c0_77 = arith.constant 0 : index
    %182 = vector.load %arg3[%181, %c0_76, %c0_77] : memref<4x8x128xf32, #tpu.memory_space<vmem>>, vector<1x8x128xf32>
    %183 = vector.shape_cast %182 : vector<1x8x128xf32> to vector<8x128xf32>
    %c0_78 = arith.constant 0 : index
    %c0_79 = arith.constant 0 : index
    %184 = vector.load %arg10[%c0_78, %c0_79] : memref<8x32xf32, #tpu.memory_space<vmem>>, vector<8x32xf32>
    %185 = arith.truncf %184 : vector<8x32xf32> to vector<8x32xbf16>
    %c0_80 = arith.constant 0 : index
    %c0_81 = arith.constant 0 : index
    %186 = vector.load %arg5[%c0_80, %c0_81] : memref<32x128xbf16, #tpu.memory_space<vmem>>, vector<32x128xbf16>
    %cst_82 = arith.constant dense<0.000000e+00> : vector<8x128xf32>
    %187 = tpu.matmul %185, %186, %cst_82 {dimension_numbers = #tpu.dot_dimension_numbers<[1], [0], [0], [1], [0, 0, 1, 1], [], []>} : vector<8x32xbf16>, vector<32x128xbf16>, vector<8x128xf32> -> vector<8x128xf32>
    %188 = arith.addf %183, %187 : vector<8x128xf32>
    %189 = vector.extract_strided_slice %188 {offsets = [0, 0], sizes = [8, 32], strides = [1, 1]} : vector<8x128xf32> to vector<8x32xf32>
    %190 = arith.negf %189 : vector<8x32xf32>
    %191 = math.exp %190 : vector<8x32xf32>
    %cst_83 = arith.constant 1.000000e+00 : f32
    %192 = vector.broadcast %cst_83 : f32 to vector<8x32xf32>
    %193 = arith.addf %192, %191 : vector<8x32xf32>
    %194 = arith.divf %192, %193 : vector<8x32xf32>
    %195 = vector.extract_strided_slice %188 {offsets = [0, 32], sizes = [8, 32], strides = [1, 1]} : vector<8x128xf32> to vector<8x32xf32>
    %196 = arith.negf %195 : vector<8x32xf32>
    %197 = math.exp %196 : vector<8x32xf32>
    %cst_84 = arith.constant 1.000000e+00 : f32
    %198 = vector.broadcast %cst_84 : f32 to vector<8x32xf32>
    %199 = arith.addf %198, %197 : vector<8x32xf32>
    %200 = arith.divf %198, %199 : vector<8x32xf32>
    %201 = vector.extract_strided_slice %188 {offsets = [0, 64], sizes = [8, 32], strides = [1, 1]} : vector<8x128xf32> to vector<8x32xf32>
    %202 = math.tanh %201 : vector<8x32xf32>
    %203 = vector.extract_strided_slice %188 {offsets = [0, 96], sizes = [8, 32], strides = [1, 1]} : vector<8x128xf32> to vector<8x32xf32>
    %204 = arith.negf %203 : vector<8x32xf32>
    %205 = math.exp %204 : vector<8x32xf32>
    %cst_85 = arith.constant 1.000000e+00 : f32
    %206 = vector.broadcast %cst_85 : f32 to vector<8x32xf32>
    %207 = arith.addf %206, %205 : vector<8x32xf32>
    %208 = arith.divf %206, %207 : vector<8x32xf32>
    %c0_86 = arith.constant 0 : index
    %c0_87 = arith.constant 0 : index
    %209 = vector.load %arg11[%c0_86, %c0_87] : memref<8x32xf32, #tpu.memory_space<vmem>>, vector<8x32xf32>
    %210 = arith.mulf %200, %209 : vector<8x32xf32>
    %211 = arith.mulf %194, %202 : vector<8x32xf32>
    %212 = arith.addf %210, %211 : vector<8x32xf32>
    %213 = math.tanh %212 : vector<8x32xf32>
    %214 = arith.mulf %208, %213 : vector<8x32xf32>
    %215 = vector.broadcast %180 : i32 to vector<8x1xi32>
    %216 = arith.cmpi slt, %215, %3 : vector<8x1xi32>
    %c0_88 = arith.constant 0 : index
    %c0_89 = arith.constant 0 : index
    %217 = vector.load %arg10[%c0_88, %c0_89] : memref<8x32xf32, #tpu.memory_space<vmem>>, vector<8x32xf32>
    %218 = vector.shape_cast %216 : vector<8x1xi1> to vector<8x1xi1>
    %219 = vector.broadcast %218 : vector<8x1xi1> to vector<8x32xi1>
    %220 = arith.select %219, %214, %217 : vector<8x32xi1>, vector<8x32xf32>
    %c0_90 = arith.constant 0 : index
    %c0_91 = arith.constant 0 : index
    %221 = vector.load %arg10[%c0_90, %c0_91] : memref<8x32xf32, #tpu.memory_space<vmem>>, vector<8x32xf32>
    tpu.vector_store %arg10[%c0_90, %c0_91], %220 {strides = array<i32>} : memref<8x32xf32, #tpu.memory_space<vmem>>, vector<8x32xf32>,
    %c0_92 = arith.constant 0 : index
    %c0_93 = arith.constant 0 : index
    %222 = vector.load %arg11[%c0_92, %c0_93] : memref<8x32xf32, #tpu.memory_space<vmem>>, vector<8x32xf32>
    %223 = vector.shape_cast %216 : vector<8x1xi1> to vector<8x1xi1>
    %224 = vector.broadcast %223 : vector<8x1xi1> to vector<8x32xi1>
    %225 = arith.select %224, %212, %222 : vector<8x32xi1>, vector<8x32xf32>
    %c0_94 = arith.constant 0 : index
    %c0_95 = arith.constant 0 : index
    %226 = vector.load %arg11[%c0_94, %c0_95] : memref<8x32xf32, #tpu.memory_space<vmem>>, vector<8x32xf32>
    tpu.vector_store %arg11[%c0_94, %c0_95], %225 {strides = array<i32>} : memref<8x32xf32, #tpu.memory_space<vmem>>, vector<8x32xf32>,
    %cst_96 = arith.constant 0.000000e+00 : f32
    %227 = vector.shape_cast %216 : vector<8x1xi1> to vector<8x1xi1>
    %228 = vector.broadcast %227 : vector<8x1xi1> to vector<8x32xi1>
    %229 = vector.broadcast %cst_96 : f32 to vector<8x32xf32>
    %230 = arith.select %228, %214, %229 : vector<8x32xi1>, vector<8x32xf32>
    %231 = arith.truncf %230 : vector<8x32xf32> to vector<8x32xbf16>
    %232 = arith.index_cast %177 : i32 to index
    %c0_97 = arith.constant 0 : index
    %c0_98 = arith.constant 0 : index
    %233 = vector.load %arg7[%232, %c0_97, %c0_98] : memref<4x8x32xbf16, #tpu.memory_space<vmem>>, vector<1x8x32xbf16>
    %234 = vector.shape_cast %233 : vector<1x8x32xbf16> to vector<8x32xbf16>
    %235 = vector.shape_cast %231 : vector<8x32xbf16> to vector<1x8x32xbf16>
    tpu.vector_store %arg7[%232, %c0_97, %c0_98], %235 {strides = array<i32>} : memref<4x8x32xbf16, #tpu.memory_space<vmem>>, vector<1x8x32xbf16>,
    %c2_i32_99 = arith.constant 2 : i32
    %c4_i32_100 = arith.constant 4 : i32
    %236 = arith.muli %arg0, %c4_i32_100 : i32
    %237 = arith.addi %236, %c2_i32_99 : i32
    %238 = arith.index_cast %c2_i32_99 : i32 to index
    %c0_101 = arith.constant 0 : index
    %c0_102 = arith.constant 0 : index
    %239 = vector.load %arg2[%238, %c0_101, %c0_102] : memref<4x8x128xf32, #tpu.memory_space<vmem>>, vector<1x8x128xf32>
    %240 = vector.shape_cast %239 : vector<1x8x128xf32> to vector<8x128xf32>
    %c0_103 = arith.constant 0 : index
    %c0_104 = arith.constant 0 : index
    %241 = vector.load %arg8[%c0_103, %c0_104] : memref<8x32xf32, #tpu.memory_space<vmem>>, vector<8x32xf32>
    %242 = arith.truncf %241 : vector<8x32xf32> to vector<8x32xbf16>
    %c0_105 = arith.constant 0 : index
    %c0_106 = arith.constant 0 : index
    %243 = vector.load %arg4[%c0_105, %c0_106] : memref<32x128xbf16, #tpu.memory_space<vmem>>, vector<32x128xbf16>
    %cst_107 = arith.constant dense<0.000000e+00> : vector<8x128xf32>
    %244 = tpu.matmul %242, %243, %cst_107 {dimension_numbers = #tpu.dot_dimension_numbers<[1], [0], [0], [1], [0, 0, 1, 1], [], []>} : vector<8x32xbf16>, vector<32x128xbf16>, vector<8x128xf32> -> vector<8x128xf32>
    %245 = arith.addf %240, %244 : vector<8x128xf32>
    %246 = vector.extract_strided_slice %245 {offsets = [0, 0], sizes = [8, 32], strides = [1, 1]} : vector<8x128xf32> to vector<8x32xf32>
    %247 = arith.negf %246 : vector<8x32xf32>
    %248 = math.exp %247 : vector<8x32xf32>
    %cst_108 = arith.constant 1.000000e+00 : f32
    %249 = vector.broadcast %cst_108 : f32 to vector<8x32xf32>
    %250 = arith.addf %249, %248 : vector<8x32xf32>
    %251 = arith.divf %249, %250 : vector<8x32xf32>
    %252 = vector.extract_strided_slice %245 {offsets = [0, 32], sizes = [8, 32], strides = [1, 1]} : vector<8x128xf32> to vector<8x32xf32>
    %253 = arith.negf %252 : vector<8x32xf32>
    %254 = math.exp %253 : vector<8x32xf32>
    %cst_109 = arith.constant 1.000000e+00 : f32
    %255 = vector.broadcast %cst_109 : f32 to vector<8x32xf32>
    %256 = arith.addf %255, %254 : vector<8x32xf32>
    %257 = arith.divf %255, %256 : vector<8x32xf32>
    %258 = vector.extract_strided_slice %245 {offsets = [0, 64], sizes = [8, 32], strides = [1, 1]} : vector<8x128xf32> to vector<8x32xf32>
    %259 = math.tanh %258 : vector<8x32xf32>
    %260 = vector.extract_strided_slice %245 {offsets = [0, 96], sizes = [8, 32], strides = [1, 1]} : vector<8x128xf32> to vector<8x32xf32>
    %261 = arith.negf %260 : vector<8x32xf32>
    %262 = math.exp %261 : vector<8x32xf32>
    %cst_110 = arith.constant 1.000000e+00 : f32
    %263 = vector.broadcast %cst_110 : f32 to vector<8x32xf32>
    %264 = arith.addf %263, %262 : vector<8x32xf32>
    %265 = arith.divf %263, %264 : vector<8x32xf32>
    %c0_111 = arith.constant 0 : index
    %c0_112 = arith.constant 0 : index
    %266 = vector.load %arg9[%c0_111, %c0_112] : memref<8x32xf32, #tpu.memory_space<vmem>>, vector<8x32xf32>
    %267 = arith.mulf %257, %266 : vector<8x32xf32>
    %268 = arith.mulf %251, %259 : vector<8x32xf32>
    %269 = arith.addf %267, %268 : vector<8x32xf32>
    %270 = math.tanh %269 : vector<8x32xf32>
    %271 = arith.mulf %265, %270 : vector<8x32xf32>
    %272 = vector.broadcast %237 : i32 to vector<8x1xi32>
    %273 = arith.cmpi slt, %272, %3 : vector<8x1xi32>
    %c0_113 = arith.constant 0 : index
    %c0_114 = arith.constant 0 : index
    %274 = vector.load %arg8[%c0_113, %c0_114] : memref<8x32xf32, #tpu.memory_space<vmem>>, vector<8x32xf32>
    %275 = vector.shape_cast %273 : vector<8x1xi1> to vector<8x1xi1>
    %276 = vector.broadcast %275 : vector<8x1xi1> to vector<8x32xi1>
    %277 = arith.select %276, %271, %274 : vector<8x32xi1>, vector<8x32xf32>
    %c0_115 = arith.constant 0 : index
    %c0_116 = arith.constant 0 : index
    %278 = vector.load %arg8[%c0_115, %c0_116] : memref<8x32xf32, #tpu.memory_space<vmem>>, vector<8x32xf32>
    tpu.vector_store %arg8[%c0_115, %c0_116], %277 {strides = array<i32>} : memref<8x32xf32, #tpu.memory_space<vmem>>, vector<8x32xf32>,
    %c0_117 = arith.constant 0 : index
    %c0_118 = arith.constant 0 : index
    %279 = vector.load %arg9[%c0_117, %c0_118] : memref<8x32xf32, #tpu.memory_space<vmem>>, vector<8x32xf32>
    %280 = vector.shape_cast %273 : vector<8x1xi1> to vector<8x1xi1>
    %281 = vector.broadcast %280 : vector<8x1xi1> to vector<8x32xi1>
    %282 = arith.select %281, %269, %279 : vector<8x32xi1>, vector<8x32xf32>
    %c0_119 = arith.constant 0 : index
    %c0_120 = arith.constant 0 : index
    %283 = vector.load %arg9[%c0_119, %c0_120] : memref<8x32xf32, #tpu.memory_space<vmem>>, vector<8x32xf32>
    tpu.vector_store %arg9[%c0_119, %c0_120], %282 {strides = array<i32>} : memref<8x32xf32, #tpu.memory_space<vmem>>, vector<8x32xf32>,
    %cst_121 = arith.constant 0.000000e+00 : f32
    %284 = vector.shape_cast %273 : vector<8x1xi1> to vector<8x1xi1>
    %285 = vector.broadcast %284 : vector<8x1xi1> to vector<8x32xi1>
    %286 = vector.broadcast %cst_121 : f32 to vector<8x32xf32>
    %287 = arith.select %285, %271, %286 : vector<8x32xi1>, vector<8x32xf32>
    %288 = arith.truncf %287 : vector<8x32xf32> to vector<8x32xbf16>
    %289 = arith.index_cast %c2_i32_99 : i32 to index
    %c0_122 = arith.constant 0 : index
    %c0_123 = arith.constant 0 : index
    %290 = vector.load %arg6[%289, %c0_122, %c0_123] : memref<4x8x32xbf16, #tpu.memory_space<vmem>>, vector<1x8x32xbf16>
    %291 = vector.shape_cast %290 : vector<1x8x32xbf16> to vector<8x32xbf16>
    %292 = vector.shape_cast %288 : vector<8x32xbf16> to vector<1x8x32xbf16>
    tpu.vector_store %arg6[%289, %c0_122, %c0_123], %292 {strides = array<i32>} : memref<4x8x32xbf16, #tpu.memory_space<vmem>>, vector<1x8x32xbf16>,
    %c3_i32_124 = arith.constant 3 : i32
    %293 = arith.subi %c3_i32_124, %c2_i32_99 : i32
    %c2_i32_125 = arith.constant 2 : i32
    %294 = arith.subi %c2_i32_125, %arg0 : i32
    %c4_i32_126 = arith.constant 4 : i32
    %295 = arith.muli %294, %c4_i32_126 : i32
    %296 = arith.addi %295, %293 : i32
    %297 = arith.index_cast %293 : i32 to index
    %c0_127 = arith.constant 0 : index
    %c0_128 = arith.constant 0 : index
    %298 = vector.load %arg3[%297, %c0_127, %c0_128] : memref<4x8x128xf32, #tpu.memory_space<vmem>>, vector<1x8x128xf32>
    %299 = vector.shape_cast %298 : vector<1x8x128xf32> to vector<8x128xf32>
    %c0_129 = arith.constant 0 : index
    %c0_130 = arith.constant 0 : index
    %300 = vector.load %arg10[%c0_129, %c0_130] : memref<8x32xf32, #tpu.memory_space<vmem>>, vector<8x32xf32>
    %301 = arith.truncf %300 : vector<8x32xf32> to vector<8x32xbf16>
    %c0_131 = arith.constant 0 : index
    %c0_132 = arith.constant 0 : index
    %302 = vector.load %arg5[%c0_131, %c0_132] : memref<32x128xbf16, #tpu.memory_space<vmem>>, vector<32x128xbf16>
    %cst_133 = arith.constant dense<0.000000e+00> : vector<8x128xf32>
    %303 = tpu.matmul %301, %302, %cst_133 {dimension_numbers = #tpu.dot_dimension_numbers<[1], [0], [0], [1], [0, 0, 1, 1], [], []>} : vector<8x32xbf16>, vector<32x128xbf16>, vector<8x128xf32> -> vector<8x128xf32>
    %304 = arith.addf %299, %303 : vector<8x128xf32>
    %305 = vector.extract_strided_slice %304 {offsets = [0, 0], sizes = [8, 32], strides = [1, 1]} : vector<8x128xf32> to vector<8x32xf32>
    %306 = arith.negf %305 : vector<8x32xf32>
    %307 = math.exp %306 : vector<8x32xf32>
    %cst_134 = arith.constant 1.000000e+00 : f32
    %308 = vector.broadcast %cst_134 : f32 to vector<8x32xf32>
    %309 = arith.addf %308, %307 : vector<8x32xf32>
    %310 = arith.divf %308, %309 : vector<8x32xf32>
    %311 = vector.extract_strided_slice %304 {offsets = [0, 32], sizes = [8, 32], strides = [1, 1]} : vector<8x128xf32> to vector<8x32xf32>
    %312 = arith.negf %311 : vector<8x32xf32>
    %313 = math.exp %312 : vector<8x32xf32>
    %cst_135 = arith.constant 1.000000e+00 : f32
    %314 = vector.broadcast %cst_135 : f32 to vector<8x32xf32>
    %315 = arith.addf %314, %313 : vector<8x32xf32>
    %316 = arith.divf %314, %315 : vector<8x32xf32>
    %317 = vector.extract_strided_slice %304 {offsets = [0, 64], sizes = [8, 32], strides = [1, 1]} : vector<8x128xf32> to vector<8x32xf32>
    %318 = math.tanh %317 : vector<8x32xf32>
    %319 = vector.extract_strided_slice %304 {offsets = [0, 96], sizes = [8, 32], strides = [1, 1]} : vector<8x128xf32> to vector<8x32xf32>
    %320 = arith.negf %319 : vector<8x32xf32>
    %321 = math.exp %320 : vector<8x32xf32>
    %cst_136 = arith.constant 1.000000e+00 : f32
    %322 = vector.broadcast %cst_136 : f32 to vector<8x32xf32>
    %323 = arith.addf %322, %321 : vector<8x32xf32>
    %324 = arith.divf %322, %323 : vector<8x32xf32>
    %c0_137 = arith.constant 0 : index
    %c0_138 = arith.constant 0 : index
    %325 = vector.load %arg11[%c0_137, %c0_138] : memref<8x32xf32, #tpu.memory_space<vmem>>, vector<8x32xf32>
    %326 = arith.mulf %316, %325 : vector<8x32xf32>
    %327 = arith.mulf %310, %318 : vector<8x32xf32>
    %328 = arith.addf %326, %327 : vector<8x32xf32>
    %329 = math.tanh %328 : vector<8x32xf32>
    %330 = arith.mulf %324, %329 : vector<8x32xf32>
    %331 = vector.broadcast %296 : i32 to vector<8x1xi32>
    %332 = arith.cmpi slt, %331, %3 : vector<8x1xi32>
    %c0_139 = arith.constant 0 : index
    %c0_140 = arith.constant 0 : index
    %333 = vector.load %arg10[%c0_139, %c0_140] : memref<8x32xf32, #tpu.memory_space<vmem>>, vector<8x32xf32>
    %334 = vector.shape_cast %332 : vector<8x1xi1> to vector<8x1xi1>
    %335 = vector.broadcast %334 : vector<8x1xi1> to vector<8x32xi1>
    %336 = arith.select %335, %330, %333 : vector<8x32xi1>, vector<8x32xf32>
    %c0_141 = arith.constant 0 : index
    %c0_142 = arith.constant 0 : index
    %337 = vector.load %arg10[%c0_141, %c0_142] : memref<8x32xf32, #tpu.memory_space<vmem>>, vector<8x32xf32>
    tpu.vector_store %arg10[%c0_141, %c0_142], %336 {strides = array<i32>} : memref<8x32xf32, #tpu.memory_space<vmem>>, vector<8x32xf32>,
    %c0_143 = arith.constant 0 : index
    %c0_144 = arith.constant 0 : index
    %338 = vector.load %arg11[%c0_143, %c0_144] : memref<8x32xf32, #tpu.memory_space<vmem>>, vector<8x32xf32>
    %339 = vector.shape_cast %332 : vector<8x1xi1> to vector<8x1xi1>
    %340 = vector.broadcast %339 : vector<8x1xi1> to vector<8x32xi1>
    %341 = arith.select %340, %328, %338 : vector<8x32xi1>, vector<8x32xf32>
    %c0_145 = arith.constant 0 : index
    %c0_146 = arith.constant 0 : index
    %342 = vector.load %arg11[%c0_145, %c0_146] : memref<8x32xf32, #tpu.memory_space<vmem>>, vector<8x32xf32>
    tpu.vector_store %arg11[%c0_145, %c0_146], %341 {strides = array<i32>} : memref<8x32xf32, #tpu.memory_space<vmem>>, vector<8x32xf32>,
    %cst_147 = arith.constant 0.000000e+00 : f32
    %343 = vector.shape_cast %332 : vector<8x1xi1> to vector<8x1xi1>
    %344 = vector.broadcast %343 : vector<8x1xi1> to vector<8x32xi1>
    %345 = vector.broadcast %cst_147 : f32 to vector<8x32xf32>
    %346 = arith.select %344, %330, %345 : vector<8x32xi1>, vector<8x32xf32>
    %347 = arith.truncf %346 : vector<8x32xf32> to vector<8x32xbf16>
    %348 = arith.index_cast %293 : i32 to index
    %c0_148 = arith.constant 0 : index
    %c0_149 = arith.constant 0 : index
    %349 = vector.load %arg7[%348, %c0_148, %c0_149] : memref<4x8x32xbf16, #tpu.memory_space<vmem>>, vector<1x8x32xbf16>
    %350 = vector.shape_cast %349 : vector<1x8x32xbf16> to vector<8x32xbf16>
    %351 = vector.shape_cast %347 : vector<8x32xbf16> to vector<1x8x32xbf16>
    tpu.vector_store %arg7[%348, %c0_148, %c0_149], %351 {strides = array<i32>} : memref<4x8x32xbf16, #tpu.memory_space<vmem>>, vector<1x8x32xbf16>,
    %c3_i32_150 = arith.constant 3 : i32
    %c4_i32_151 = arith.constant 4 : i32
    %352 = arith.muli %arg0, %c4_i32_151 : i32
    %353 = arith.addi %352, %c3_i32_150 : i32
    %354 = arith.index_cast %c3_i32_150 : i32 to index
    %c0_152 = arith.constant 0 : index
    %c0_153 = arith.constant 0 : index
    %355 = vector.load %arg2[%354, %c0_152, %c0_153] : memref<4x8x128xf32, #tpu.memory_space<vmem>>, vector<1x8x128xf32>
    %356 = vector.shape_cast %355 : vector<1x8x128xf32> to vector<8x128xf32>
    %c0_154 = arith.constant 0 : index
    %c0_155 = arith.constant 0 : index
    %357 = vector.load %arg8[%c0_154, %c0_155] : memref<8x32xf32, #tpu.memory_space<vmem>>, vector<8x32xf32>
    %358 = arith.truncf %357 : vector<8x32xf32> to vector<8x32xbf16>
    %c0_156 = arith.constant 0 : index
    %c0_157 = arith.constant 0 : index
    %359 = vector.load %arg4[%c0_156, %c0_157] : memref<32x128xbf16, #tpu.memory_space<vmem>>, vector<32x128xbf16>
    %cst_158 = arith.constant dense<0.000000e+00> : vector<8x128xf32>
    %360 = tpu.matmul %358, %359, %cst_158 {dimension_numbers = #tpu.dot_dimension_numbers<[1], [0], [0], [1], [0, 0, 1, 1], [], []>} : vector<8x32xbf16>, vector<32x128xbf16>, vector<8x128xf32> -> vector<8x128xf32>
    %361 = arith.addf %356, %360 : vector<8x128xf32>
    %362 = vector.extract_strided_slice %361 {offsets = [0, 0], sizes = [8, 32], strides = [1, 1]} : vector<8x128xf32> to vector<8x32xf32>
    %363 = arith.negf %362 : vector<8x32xf32>
    %364 = math.exp %363 : vector<8x32xf32>
    %cst_159 = arith.constant 1.000000e+00 : f32
    %365 = vector.broadcast %cst_159 : f32 to vector<8x32xf32>
    %366 = arith.addf %365, %364 : vector<8x32xf32>
    %367 = arith.divf %365, %366 : vector<8x32xf32>
    %368 = vector.extract_strided_slice %361 {offsets = [0, 32], sizes = [8, 32], strides = [1, 1]} : vector<8x128xf32> to vector<8x32xf32>
    %369 = arith.negf %368 : vector<8x32xf32>
    %370 = math.exp %369 : vector<8x32xf32>
    %cst_160 = arith.constant 1.000000e+00 : f32
    %371 = vector.broadcast %cst_160 : f32 to vector<8x32xf32>
    %372 = arith.addf %371, %370 : vector<8x32xf32>
    %373 = arith.divf %371, %372 : vector<8x32xf32>
    %374 = vector.extract_strided_slice %361 {offsets = [0, 64], sizes = [8, 32], strides = [1, 1]} : vector<8x128xf32> to vector<8x32xf32>
    %375 = math.tanh %374 : vector<8x32xf32>
    %376 = vector.extract_strided_slice %361 {offsets = [0, 96], sizes = [8, 32], strides = [1, 1]} : vector<8x128xf32> to vector<8x32xf32>
    %377 = arith.negf %376 : vector<8x32xf32>
    %378 = math.exp %377 : vector<8x32xf32>
    %cst_161 = arith.constant 1.000000e+00 : f32
    %379 = vector.broadcast %cst_161 : f32 to vector<8x32xf32>
    %380 = arith.addf %379, %378 : vector<8x32xf32>
    %381 = arith.divf %379, %380 : vector<8x32xf32>
    %c0_162 = arith.constant 0 : index
    %c0_163 = arith.constant 0 : index
    %382 = vector.load %arg9[%c0_162, %c0_163] : memref<8x32xf32, #tpu.memory_space<vmem>>, vector<8x32xf32>
    %383 = arith.mulf %373, %382 : vector<8x32xf32>
    %384 = arith.mulf %367, %375 : vector<8x32xf32>
    %385 = arith.addf %383, %384 : vector<8x32xf32>
    %386 = math.tanh %385 : vector<8x32xf32>
    %387 = arith.mulf %381, %386 : vector<8x32xf32>
    %388 = vector.broadcast %353 : i32 to vector<8x1xi32>
    %389 = arith.cmpi slt, %388, %3 : vector<8x1xi32>
    %c0_164 = arith.constant 0 : index
    %c0_165 = arith.constant 0 : index
    %390 = vector.load %arg8[%c0_164, %c0_165] : memref<8x32xf32, #tpu.memory_space<vmem>>, vector<8x32xf32>
    %391 = vector.shape_cast %389 : vector<8x1xi1> to vector<8x1xi1>
    %392 = vector.broadcast %391 : vector<8x1xi1> to vector<8x32xi1>
    %393 = arith.select %392, %387, %390 : vector<8x32xi1>, vector<8x32xf32>
    %c0_166 = arith.constant 0 : index
    %c0_167 = arith.constant 0 : index
    %394 = vector.load %arg8[%c0_166, %c0_167] : memref<8x32xf32, #tpu.memory_space<vmem>>, vector<8x32xf32>
    tpu.vector_store %arg8[%c0_166, %c0_167], %393 {strides = array<i32>} : memref<8x32xf32, #tpu.memory_space<vmem>>, vector<8x32xf32>,
    %c0_168 = arith.constant 0 : index
    %c0_169 = arith.constant 0 : index
    %395 = vector.load %arg9[%c0_168, %c0_169] : memref<8x32xf32, #tpu.memory_space<vmem>>, vector<8x32xf32>
    %396 = vector.shape_cast %389 : vector<8x1xi1> to vector<8x1xi1>
    %397 = vector.broadcast %396 : vector<8x1xi1> to vector<8x32xi1>
    %398 = arith.select %397, %385, %395 : vector<8x32xi1>, vector<8x32xf32>
    %c0_170 = arith.constant 0 : index
    %c0_171 = arith.constant 0 : index
    %399 = vector.load %arg9[%c0_170, %c0_171] : memref<8x32xf32, #tpu.memory_space<vmem>>, vector<8x32xf32>
    tpu.vector_store %arg9[%c0_170, %c0_171], %398 {strides = array<i32>} : memref<8x32xf32, #tpu.memory_space<vmem>>, vector<8x32xf32>,
    %cst_172 = arith.constant 0.000000e+00 : f32
    %400 = vector.shape_cast %389 : vector<8x1xi1> to vector<8x1xi1>
    %401 = vector.broadcast %400 : vector<8x1xi1> to vector<8x32xi1>
    %402 = vector.broadcast %cst_172 : f32 to vector<8x32xf32>
    %403 = arith.select %401, %387, %402 : vector<8x32xi1>, vector<8x32xf32>
    %404 = arith.truncf %403 : vector<8x32xf32> to vector<8x32xbf16>
    %405 = arith.index_cast %c3_i32_150 : i32 to index
    %c0_173 = arith.constant 0 : index
    %c0_174 = arith.constant 0 : index
    %406 = vector.load %arg6[%405, %c0_173, %c0_174] : memref<4x8x32xbf16, #tpu.memory_space<vmem>>, vector<1x8x32xbf16>
    %407 = vector.shape_cast %406 : vector<1x8x32xbf16> to vector<8x32xbf16>
    %408 = vector.shape_cast %404 : vector<8x32xbf16> to vector<1x8x32xbf16>
    tpu.vector_store %arg6[%405, %c0_173, %c0_174], %408 {strides = array<i32>} : memref<4x8x32xbf16, #tpu.memory_space<vmem>>, vector<1x8x32xbf16>,
    %c3_i32_175 = arith.constant 3 : i32
    %409 = arith.subi %c3_i32_175, %c3_i32_150 : i32
    %c2_i32_176 = arith.constant 2 : i32
    %410 = arith.subi %c2_i32_176, %arg0 : i32
    %c4_i32_177 = arith.constant 4 : i32
    %411 = arith.muli %410, %c4_i32_177 : i32
    %412 = arith.addi %411, %409 : i32
    %413 = arith.index_cast %409 : i32 to index
    %c0_178 = arith.constant 0 : index
    %c0_179 = arith.constant 0 : index
    %414 = vector.load %arg3[%413, %c0_178, %c0_179] : memref<4x8x128xf32, #tpu.memory_space<vmem>>, vector<1x8x128xf32>
    %415 = vector.shape_cast %414 : vector<1x8x128xf32> to vector<8x128xf32>
    %c0_180 = arith.constant 0 : index
    %c0_181 = arith.constant 0 : index
    %416 = vector.load %arg10[%c0_180, %c0_181] : memref<8x32xf32, #tpu.memory_space<vmem>>, vector<8x32xf32>
    %417 = arith.truncf %416 : vector<8x32xf32> to vector<8x32xbf16>
    %c0_182 = arith.constant 0 : index
    %c0_183 = arith.constant 0 : index
    %418 = vector.load %arg5[%c0_182, %c0_183] : memref<32x128xbf16, #tpu.memory_space<vmem>>, vector<32x128xbf16>
    %cst_184 = arith.constant dense<0.000000e+00> : vector<8x128xf32>
    %419 = tpu.matmul %417, %418, %cst_184 {dimension_numbers = #tpu.dot_dimension_numbers<[1], [0], [0], [1], [0, 0, 1, 1], [], []>} : vector<8x32xbf16>, vector<32x128xbf16>, vector<8x128xf32> -> vector<8x128xf32>
    %420 = arith.addf %415, %419 : vector<8x128xf32>
    %421 = vector.extract_strided_slice %420 {offsets = [0, 0], sizes = [8, 32], strides = [1, 1]} : vector<8x128xf32> to vector<8x32xf32>
    %422 = arith.negf %421 : vector<8x32xf32>
    %423 = math.exp %422 : vector<8x32xf32>
    %cst_185 = arith.constant 1.000000e+00 : f32
    %424 = vector.broadcast %cst_185 : f32 to vector<8x32xf32>
    %425 = arith.addf %424, %423 : vector<8x32xf32>
    %426 = arith.divf %424, %425 : vector<8x32xf32>
    %427 = vector.extract_strided_slice %420 {offsets = [0, 32], sizes = [8, 32], strides = [1, 1]} : vector<8x128xf32> to vector<8x32xf32>
    %428 = arith.negf %427 : vector<8x32xf32>
    %429 = math.exp %428 : vector<8x32xf32>
    %cst_186 = arith.constant 1.000000e+00 : f32
    %430 = vector.broadcast %cst_186 : f32 to vector<8x32xf32>
    %431 = arith.addf %430, %429 : vector<8x32xf32>
    %432 = arith.divf %430, %431 : vector<8x32xf32>
    %433 = vector.extract_strided_slice %420 {offsets = [0, 64], sizes = [8, 32], strides = [1, 1]} : vector<8x128xf32> to vector<8x32xf32>
    %434 = math.tanh %433 : vector<8x32xf32>
    %435 = vector.extract_strided_slice %420 {offsets = [0, 96], sizes = [8, 32], strides = [1, 1]} : vector<8x128xf32> to vector<8x32xf32>
    %436 = arith.negf %435 : vector<8x32xf32>
    %437 = math.exp %436 : vector<8x32xf32>
    %cst_187 = arith.constant 1.000000e+00 : f32
    %438 = vector.broadcast %cst_187 : f32 to vector<8x32xf32>
    %439 = arith.addf %438, %437 : vector<8x32xf32>
    %440 = arith.divf %438, %439 : vector<8x32xf32>
    %c0_188 = arith.constant 0 : index
    %c0_189 = arith.constant 0 : index
    %441 = vector.load %arg11[%c0_188, %c0_189] : memref<8x32xf32, #tpu.memory_space<vmem>>, vector<8x32xf32>
    %442 = arith.mulf %432, %441 : vector<8x32xf32>
    %443 = arith.mulf %426, %434 : vector<8x32xf32>
    %444 = arith.addf %442, %443 : vector<8x32xf32>
    %445 = math.tanh %444 : vector<8x32xf32>
    %446 = arith.mulf %440, %445 : vector<8x32xf32>
    %447 = vector.broadcast %412 : i32 to vector<8x1xi32>
    %448 = arith.cmpi slt, %447, %3 : vector<8x1xi32>
    %c0_190 = arith.constant 0 : index
    %c0_191 = arith.constant 0 : index
    %449 = vector.load %arg10[%c0_190, %c0_191] : memref<8x32xf32, #tpu.memory_space<vmem>>, vector<8x32xf32>
    %450 = vector.shape_cast %448 : vector<8x1xi1> to vector<8x1xi1>
    %451 = vector.broadcast %450 : vector<8x1xi1> to vector<8x32xi1>
    %452 = arith.select %451, %446, %449 : vector<8x32xi1>, vector<8x32xf32>
    %c0_192 = arith.constant 0 : index
    %c0_193 = arith.constant 0 : index
    %453 = vector.load %arg10[%c0_192, %c0_193] : memref<8x32xf32, #tpu.memory_space<vmem>>, vector<8x32xf32>
    tpu.vector_store %arg10[%c0_192, %c0_193], %452 {strides = array<i32>} : memref<8x32xf32, #tpu.memory_space<vmem>>, vector<8x32xf32>,
    %c0_194 = arith.constant 0 : index
    %c0_195 = arith.constant 0 : index
    %454 = vector.load %arg11[%c0_194, %c0_195] : memref<8x32xf32, #tpu.memory_space<vmem>>, vector<8x32xf32>
    %455 = vector.shape_cast %448 : vector<8x1xi1> to vector<8x1xi1>
    %456 = vector.broadcast %455 : vector<8x1xi1> to vector<8x32xi1>
    %457 = arith.select %456, %444, %454 : vector<8x32xi1>, vector<8x32xf32>
    %c0_196 = arith.constant 0 : index
    %c0_197 = arith.constant 0 : index
    %458 = vector.load %arg11[%c0_196, %c0_197] : memref<8x32xf32, #tpu.memory_space<vmem>>, vector<8x32xf32>
    tpu.vector_store %arg11[%c0_196, %c0_197], %457 {strides = array<i32>} : memref<8x32xf32, #tpu.memory_space<vmem>>, vector<8x32xf32>,
    %cst_198 = arith.constant 0.000000e+00 : f32
    %459 = vector.shape_cast %448 : vector<8x1xi1> to vector<8x1xi1>
    %460 = vector.broadcast %459 : vector<8x1xi1> to vector<8x32xi1>
    %461 = vector.broadcast %cst_198 : f32 to vector<8x32xf32>
    %462 = arith.select %460, %446, %461 : vector<8x32xi1>, vector<8x32xf32>
    %463 = arith.truncf %462 : vector<8x32xf32> to vector<8x32xbf16>
    %464 = arith.index_cast %409 : i32 to index
    %c0_199 = arith.constant 0 : index
    %c0_200 = arith.constant 0 : index
    %465 = vector.load %arg7[%464, %c0_199, %c0_200] : memref<4x8x32xbf16, #tpu.memory_space<vmem>>, vector<1x8x32xbf16>
    %466 = vector.shape_cast %465 : vector<1x8x32xbf16> to vector<8x32xbf16>
    %467 = vector.shape_cast %463 : vector<8x32xbf16> to vector<1x8x32xbf16>
    tpu.vector_store %arg7[%464, %c0_199, %c0_200], %467 {strides = array<i32>} : memref<4x8x32xbf16, #tpu.memory_space<vmem>>, vector<1x8x32xbf16>,
    %c4_i32_201 = arith.constant 4 : i32
    return
  }
  func.func @transform_0(%arg0: i32) -> (i32, i32) {
    %c0_i32 = arith.constant 0 : i32
    %c0_i32_0 = arith.constant 0 : i32
    %c0_i32_1 = arith.constant 0 : i32
    return %c0_i32, %c0_i32_0 : i32, i32
  }
  func.func @transform_1(%arg0: i32) -> (i32, i32, i32) {
    %c0_i32 = arith.constant 0 : i32
    %c0_i32_0 = arith.constant 0 : i32
    %c0_i32_1 = arith.constant 0 : i32
    return %arg0, %c0_i32, %c0_i32_0 : i32, i32, i32
  }
  func.func @transform_2(%arg0: i32) -> (i32, i32, i32) {
    %c2_i32 = arith.constant 2 : i32
    %0 = arith.subi %c2_i32, %arg0 : i32
    %c0_i32 = arith.constant 0 : i32
    %c0_i32_0 = arith.constant 0 : i32
    %c0_i32_1 = arith.constant 0 : i32
    return %0, %c0_i32, %c0_i32_0 : i32, i32, i32
  }
  func.func @transform_3(%arg0: i32) -> (i32, i32) {
    %c0_i32 = arith.constant 0 : i32
    %c0_i32_0 = arith.constant 0 : i32
    %c0_i32_1 = arith.constant 0 : i32
    return %c0_i32, %c0_i32_0 : i32, i32
  }
  func.func @transform_4(%arg0: i32) -> (i32, i32) {
    %c0_i32 = arith.constant 0 : i32
    %c0_i32_0 = arith.constant 0 : i32
    %c0_i32_1 = arith.constant 0 : i32
    return %c0_i32, %c0_i32_0 : i32, i32
  }
  func.func @transform_5(%arg0: i32) -> (i32, i32, i32) {
    %c0_i32 = arith.constant 0 : i32
    %c0_i32_0 = arith.constant 0 : i32
    %c0_i32_1 = arith.constant 0 : i32
    return %arg0, %c0_i32, %c0_i32_0 : i32, i32, i32
  }
  func.func @transform_6(%arg0: i32) -> (i32, i32, i32) {
    %c2_i32 = arith.constant 2 : i32
    %0 = arith.subi %c2_i32, %arg0 : i32
    %c0_i32 = arith.constant 0 : i32
    %c0_i32_0 = arith.constant 0 : i32
    %c0_i32_1 = arith.constant 0 : i32
    return %0, %c0_i32, %c0_i32_0 : i32, i32, i32
  }
}

</mosaic_0001>

<bundles_post_ra>
// kernel: tpu_custom_call.1
= control target key start
LH: loop header
LB: loop body
LE: loop exit
PB: predicated region body
PF: predicated region fallthrough
CT: control target
= control target key end

     0   :  { %s2917_s0 = inlined_call_operand.vmem [shape: s32[8,1], index: 0, kind: input, shape index: {}]   ;;  %s2918_s1 = inlined_call_operand.hbm [shape: f32[12,8,128], index: 1, kind: input, shape index: {}]   ;;  %s2919_s2 = inlined_call_operand.hbm [shape: f32[12,8,128], index: 2, kind: input, shape index: {}]   ;;  %s2920_s3 = inlined_call_operand.hbm [shape: bf16[32,128], index: 3, kind: input, shape index: {}]   ;;  %s2921_s4 = inlined_call_operand.vmem [shape: bf16[32,128], index: 4, kind: input, shape index: {}]   ;;  %s2922_s5 = inlined_call_operand.hbm [shape: bf16[12,8,32], index: 5, kind: output, shape index: {0}]   ;;  %s2923_s6 = inlined_call_operand.hbm [shape: bf16[12,8,32], index: 6, kind: output, shape index: {1}]  }
   0x1   :  { %2939 = sst [smem:[#allocation25_spill]] %s2918_s1 }
   0x2   :  { %2940 = sst [smem:[#allocation26_spill]] %s2920_s3 }
   0x3   :  { %12 = vsyncpa [#allocation7], 0 }
   0x4   :  { %14 = vsyncpa [#allocation7 + $0x1], 0 }
   0x5   :  { %15 = vsyncpa [#allocation10], 0 }
   0x6   :  { %17 = vsyncpa [#allocation10 + $0x1], 0 }
   0x7   :  { %18 = vsyncpa [#allocation8], 0 }
   0x8   :  { %20 = vsyncpa [#allocation8 + $0x1], 0 }
   0x9   :  { %21 = vsyncpa [#allocation14], 0 }
   0xa   :  { %23 = vsyncpa [#allocation14 + $0x1], 0  ;;  %s2211_s21 = smov 0   ;;  %s2213_s22 = smov 0  }
   0xb   :  { %s2215_s23 = smov 0   ;;  %s2217_s24 = smov 0  }
   0xc   :  { %s2219_s25 = smov 0   ;;  %s2221_s26 = smov 0  }
   0xd   :  { %s2223_s27 = smov 0  }
   0xe LB: > { %2941 = sst [smem:[#allocation20_spill]] %s2133_s21  ;;  %s2247_s28 = sadd.s32 4294967295, %s2157_s27   ;;  %s2157_s27 = sphi %s2223_s27, %s2978_s27   ;;  %s2153_s26 = sphi %s2221_s26, %s2980_s26   ;;  %s2149_s25 = sphi %s2219_s25, %s2985_s25   ;;  %s2145_s24 = sphi %s2217_s24, %s2984_s24   ;;  %s2141_s23 = sphi %s2215_s23, %s2983_s23   ;;  %s2137_s22 = sphi %s2213_s22, %s2982_s22   ;;  %s2133_s21 = sphi %s2211_s21, %s2981_s21  }
   0xf   : > { %2942 = sst [smem:[#allocation21_spill]] %s2153_s26  ;;  %s1585_s29 = sadd.s32 4294967294, %s2157_s27  }
  0x10   : > { %p70_p0 = scmp.ne.s32.totalorder %s2149_s25, %s2145_s24  ;;  %p2928_p1 = scmp.eq.s32.totalorder %s2247_s28, 0 }
  0x11   : > { %p98_p2 = scmp.ne.s32.totalorder %s2137_s22, %s2133_s21  ;;  %p170_p5 = scmp.eq.s32.totalorder %s1585_s29, 2 }
  0x12   : > { %p2258_p4 = por %p2928_p1, %p70_p0  ;;  %p1586_p7 = scmp.ge.s32.totalorder %s2157_s27, 1 }
  0x13   : > { %p2264_p6 = por %p98_p2, %p2928_p1  ;;  %p2269_p8 = por %p170_p5, %p70_p0 }
  0x14   : > { %s2943_s30 = scalar_select %p2258_p4, 1, 0 }
  0x15   : > { %s2944_s7 = scalar_select %p2264_p6, 1, 0 }
  0x16   : > { %s2945_s8 = scalar_select %p2269_p8, 1, 0 }
  0x17   : > { %p2273_p9 = por %p170_p5, %p98_p2  ;;  %p205_p10 = scmp.lt.s32.totalorder %s2157_s27, 4 }
  0x18   : > { %s2159_s11 = smov [#allocation11]   ;;  %p2931_p0 = scmp.eq.s32.totalorder %s2157_s27, 0 }
  0x19   : > { %s2946_s9 = scalar_select %p2273_p9, 1, 0 }
  0x1a   : > { %p2279_p12 = pnand %p1586_p7, %p205_p10  ;;  %s220_s12 = sshll.u32 %s2159_s11, 4  ;;  %s221_s12 = int_to_ptr.vmem [resolvable:$true] %s220_s12 }
  0x1b   : > { %2947 = sst [smem:[#allocation22_spill]] %s2946_s9  ;;  %p64_p2 = scmp.ne.s32.totalorder %s2153_s26, %s2149_s25 }
  0x1c   : > { %s2948_s10 = scalar_select %p2279_p12, 1, 0 }
  0x1d   : > { %p1776_p13 = pneg %p2279_p12  ;;  %p2930_p5 = scmp.lt.s32.totalorder %s2157_s27, 3 }
  0x1e   : > { %s1960_s15 = scalar_lea.vmem %s221_s12, 256  ;;  %p1968_p8 = scmp.lt.s32.totalorder %s221_s12, %s221_s12 }
  0x1f   : > { %p2288_p3 = pnand %p1776_p13, %p2928_p1  ;;  %p1961_p10 = scmp.ne.s32.totalorder %s221_s12, %s1960_s15 }
  0x20   : > { %p1969_p6 = scmp.lt.s32.totalorder %s1960_s15, %s1960_s15 }
  0x21   : > { %p1951_p7 = pneg %p2288_p3 }
  0x22   : > { %p1970_p4 = por %p1969_p6, %p1968_p8 }
  0x23   : > { %p1963_p11 = pnand %p1961_p10, %p1951_p7 }
  0x25   : > { %p1964_p9 = pneg %p1963_p11 }
  0x27   : > { %p1971_p12 = pnand %p1970_p4, %p1964_p9 }
  0x29   : > { %1974 = shalt.err (!%p1971_p12)
}
  0x2a   : > { %s2160_s16 = smov 64   ;;  %s2161_s17 = smov 4  }
  0x2b   : > { %s2950_s3 = sld [smem:[#allocation26_spill]]  ;;  %p66_p4 = por %p2931_p0, %p64_p2 }
  0x2c   : > { %p2951_p6 = scmp.eq.s32.totalorder %s2247_s28, 2  ;;  %s237_s29 = sand.u32 1, %s2153_s26  }
  0x2d   : > { %s1664_s11 = sshll.u32 %s2157_s27, 9  ;;  %s1589_s15 = sshll.u32 %s237_s29, 5 }
  0x2e   : > { %p2313_p8 = por %p2951_p6, %p64_p2  ;;  %s2953_s1 = sld [smem:[#allocation25_spill]] }
  0x2f   : > { %s2332_s18 = scalar_lea.sflag [#allocation7], %s237_s29 }
  0x30   : > { %s2952_s20 = scalar_select %p2313_p8, 1, 0 }
  0x31   : > { %1779 = dma.hbm_to_vmem [thread:$0]  (!%p2288_p3), %s2950_s3, 256, %s221_s12, [#allocation10], %s2160_s16, %s2160_s16, %s2161_s17  }
  0x32   : > { %s241_s12 = scalar_lea.vmem [#allocation6], %s1589_s15  ;;  %p2326_p3 = pnand %p2930_p5, %p66_p4 }
  0x33   : > { %s248_s16 = sshll.u32 %s241_s12, 4  ;;  %s2330_s16 = int_to_ptr.vmem [resolvable:$true] %s248_s16 }
  0x34   : > { %s2322_s13 = scalar_lea.hbm %s2953_s1, %s1664_s11  ;;  %p1977_p11 = pneg %p2326_p3 }
  0x35   : > { %s1975_s19 = scalar_lea.hbm %s2322_s13, 512  ;;  %s1980_s11 = scalar_lea.hbm %s2953_s1, 1536 }
  0x36   : > { %p1976_p9 = scmp.ne.s32.totalorder %s2322_s13, %s1975_s19  ;;  %p1981_p2 = scmp.lt.s32.totalorder %s2322_s13, %s2953_s1 }
  0x37   : > { %p1982_p7 = scmp.lt.s32.totalorder %s1980_s11, %s1975_s19 }
  0x38   : > { %p1978_p12 = pnand %p1977_p11, %p1976_p9 }
  0x39   : > { %p1983_p10 = por %p1982_p7, %p1981_p2 }
  0x3a   : > { %p1979_p13 = pneg %p1978_p12 }
  0x3c   : > { %p1984_p4 = pnand %p1983_p10, %p1979_p13 }
  0x3e   : > { %1987 = shalt.err (!%p1984_p4)
}
  0x3f   : > { %s1988_s29 = scalar_lea.vmem %s2330_s16, 512  ;;  %s2162_s3 = smov [#allocation6]  }
  0x40   : > { %p1989_p6 = scmp.ne.s32.totalorder %s2330_s16, %s1988_s29  ;;  %s1993_s21 = sshll.u32 %s2162_s3, 4  ;;  %s1994_s21 = int_to_ptr.vmem [resolvable:$false] %s1993_s21 }
  0x41   : > { %s1995_s9 = scalar_lea.vmem %s1994_s21, 1024  ;;  %p1996_p12 = scmp.lt.s32.totalorder %s2330_s16, %s1994_s21 }
  0x42   : > { %p1991_p1 = pnand %p1989_p6, %p1977_p11  ;;  %p1997_p5 = scmp.lt.s32.totalorder %s1995_s9, %s1988_s29 }
  0x44   : > { %p1992_p9 = pneg %p1991_p1  ;;  %p1998_p0 = por %p1997_p5, %p1996_p12 }
  0x46   : > { %p1999_p8 = pnand %p1998_p0, %p1992_p9 }
  0x48   : > { %2002 = shalt.err (!%p1999_p8)
}
  0x49   : > { %s2933_s19 = smov 128   ;;  %s2934_s3 = smov 8  }
  0x4a   : > { %1783 = dma.hbm_to_vmem [thread:$0]  (!%p2326_p3), %s2322_s13, 512, %s2330_s16, %s2332_s18, %s2933_s19, %s2933_s19, %s2934_s3  }
  0x4b   : > { %s2357_s21 = sadd.s32 1, %s2157_s27   ;;  %s80_s11 = ssub.s32 2, %s2157_s27 }
  0x4c   : > { %2955 = sst [smem:[#allocation23_spill]] %s2357_s21  ;;  %s54_s14 = ssub.s32 %s2157_s27, %s2357_s21 }
  0x4d   : > { %p55_p1 = scmp.eq.s32.totalorder %s54_s14, 0  ;;  %s81_s15 = ssub.s32 2, %s2357_s21 }
  0x4e   : > { %s85_s12 = sadd.s32 1, %s2141_s23  ;;  %s2956_s29 = sadd.s32 1, %s2153_s26 }
  0x4f   : > { %s2367_s9 = scalar_select %p55_p1, %s2153_s26, %s2956_s29  }
  0x50   : > { %s82_s1 = ssub.s32 %s80_s11, %s81_s15  ;;  %p92_p0 = scmp.ne.s32.totalorder %s2141_s23, %s2137_s22 }
  0x51   : > { %2957 = sst [smem:[#allocation24_spill]] %s2367_s9  ;;  %p83_p5 = scmp.eq.s32.totalorder %s82_s1, 0 }
  0x52   : > { %s258_s17 = sand.u32 1, %s2157_s27   ;;  %p2958_p8 = scmp.eq.s32.totalorder %s2157_s27, 0 }
  0x53   : > { %p2959_p3 = scmp.eq.s32.totalorder %s2247_s28, 2  ;;  %s260_s18 = sand.u32 1, %s2141_s23  }
  0x54   : > { %p94_p11 = por %p92_p0, %p2958_p8  ;;  %s1592_s14 = sshll.u32 %s260_s18, 5 }
  0x55   : > { %p2376_p13 = por %p2959_p3, %p92_p0  ;;  %s1665_s19 = sshll.u32 %s80_s11, 9 }
  0x56   : > { %s2381_s16 = scalar_select %p83_p5, %s2141_s23, %s85_s12  }
  0x57   : > { %s2960_s13 = scalar_select %p2376_p13, 1, 0 }
  0x58   : > { %s2387_s29 = scalar_lea.hbm %s2919_s2, %s1665_s19  ;;  %s262_s1 = scalar_lea.vmem [#allocation9], %s1592_s14 }
  0x59   : > { %s270_s15 = sshll.u32 %s262_s1, 4  ;;  %p2961_p2 = scmp.lt.s32.totalorder %s2157_s27, 3  ;;  %s2395_s15 = int_to_ptr.vmem [resolvable:$true] %s270_s15 }
  0x5a   : > { %s2397_s12 = scalar_lea.sflag [#allocation10], %s258_s17  ;;  %s2003_s11 = scalar_lea.hbm %s2387_s29, 512 }
  0x5b   : > { %p2391_p7 = pnand %p2961_p2, %p94_p11  ;;  %p2004_p10 = scmp.ne.s32.totalorder %s2387_s29, %s2003_s11 }
  0x5c   : > { %s2008_s21 = scalar_lea.hbm %s2919_s2, 1536  ;;  %p2009_p12 = scmp.lt.s32.totalorder %s2387_s29, %s2919_s2 }
  0x5d   : > { %p2005_p4 = pneg %p2391_p7  ;;  %p2010_p1 = scmp.lt.s32.totalorder %s2008_s21, %s2003_s11 }
  0x5f   : > { %p2006_p6 = pnand %p2005_p4, %p2004_p10  ;;  %p2011_p0 = por %p2010_p1, %p2009_p12 }
  0x61   : > { %p2007_p9 = pneg %p2006_p6 }
  0x63   : > { %p2012_p5 = pnand %p2011_p0, %p2007_p9 }
  0x65   : > { %2015 = shalt.err (!%p2012_p5)
}
  0x66   : > { %s2016_s17 = scalar_lea.vmem %s2395_s15, 512  ;;  %s2165_s1 = smov [#allocation9]  }
  0x67   : > { %p2017_p8 = scmp.ne.s32.totalorder %s2395_s15, %s2016_s17  ;;  %s2021_s26 = sshll.u32 %s2165_s1, 4  ;;  %s2022_s26 = int_to_ptr.vmem [resolvable:$false] %s2021_s26 }
  0x68   : > { %s2023_s19 = scalar_lea.vmem %s2022_s26, 1024  ;;  %p2024_p2 = scmp.lt.s32.totalorder %s2395_s15, %s2022_s26 }
  0x69   : > { %p2019_p11 = pnand %p2017_p8, %p2005_p4  ;;  %p2025_p10 = scmp.lt.s32.totalorder %s2023_s19, %s2016_s17 }
  0x6b   : > { %p2020_p3 = pneg %p2019_p11  ;;  %p2026_p6 = por %p2025_p10, %p2024_p2 }
  0x6d   : > { %p2027_p13 = pnand %p2026_p6, %p2020_p3 }
  0x6f   : > { %2030 = shalt.err (!%p2027_p13)
}
  0x70   : > { %s2963_s11 = smov 8   ;;  %s2964_s3 = smov 128  }
  0x71   : > { %1786 = dma.hbm_to_vmem [thread:$0]  (!%p2391_p7), %s2387_s29, 512, %s2395_s15, %s2397_s12, %s2964_s3, %s2964_s3, %s2963_s11  }
  0x72   : > { %p2965_p4 = scmp.ne.s32.totalorder %s2948_s10, 0 }
  0x73   : > { %s2424_s21 = sand.u32 (!%p2965_p4), 1, %s2149_s25   ;;  %p2966_p13 = scmp.ne.s32.totalorder (!%p2965_p4), %s2943_s30, 0 }
  0x74   : > { %282 = sbr.rel (%p2965_p4) target bundleno = 2992 (0xbb0), region = 40  ;;  %s1596_s26 = sshll.u32 (!%p2965_p4), %s2424_s21, 5 }
  0x75   : > { %s285_s18 = scalar_lea.sflag (!%p2965_p4), [#allocation7], %s2424_s21  ;;  %s2428_s14 = scalar_lea.vmem (!%p2965_p4), [#allocation6], %s1596_s26 }
  0x79   : > { %2112 = dma.done.wait (%p2966_p13), %s285_s18, 512  }
  0x7a   : > { %2114 = vsyncadd (%p2966_p13), %s285_s18, 4294966784  ;;  %s293_s10 = sand.u32 1, %s2247_s28   ;;  %s2436_s9 = sand.u32 1, %s2137_s22  }
  0x7b   : > { %s1597_s29 = sshll.u32 %s2436_s9, 5  ;;  %s294_s15 = scalar_lea.sflag [#allocation10], %s293_s10 }
  0x7c   : > { %s2439_s12 = scalar_lea.vmem [#allocation9], %s1597_s29  ;;  %p2967_p7 = scmp.ne.s32.totalorder %s2944_s7, 0 }
  0x7e   : > { %2116 = dma.done.wait (%p2967_p7), %s294_s15, 512  }
  0x7f   : > { %2118 = vsyncadd (%p2967_p7), %s294_s15, 4294966784  ;;  %p2968_p9 = scmp.eq.s32.totalorder %s2247_s28, 0 }
  0x81   : > { %2120 = dma.done.wait (%p2968_p9), [#allocation10], 256   ;;  %p2969_p12 = pmov %p2968_p9 }
  0x82   : > { %s1599_s30 = sshll.u32 %s2424_s21, 4  ;;  %s1600_s17 = sshll.u32 %s2436_s9, 4 }
  0x83   : > { %2122 = vsyncadd (%p2969_p12), [#allocation10], 4294967040  ;;  %s2451_s1 = scalar_lea.vmem [#allocation12], %s1599_s30  ;;  %s2453_s19 = scalar_lea.vmem [#allocation13], %s1600_s17 }
  0x84   : > { %p2970_p1 = scmp.ne.s32.totalorder %s2247_s28, 0 }
  0x86   : > { %350 = sbr.rel (%p2970_p1) target bundleno = 142 (0x8e), region = 56 }
  0x8b   : > { %vm351_vm0 = vcmask 261120   ;;  %v2166_v0 = vmov 0.0  }
  0x8c   : > { %352 = vst.msk [vmem:[#allocation2] sm:$0xff] %vm351_vm0, %v2166_v0  ;;  %353 = vst.msk [vmem:[#allocation3] sm:$0xff] %vm351_vm0, %v2166_v0 }
  0x8d   : > { %354 = vst.msk [vmem:[#allocation4] sm:$0xff] %vm351_vm0, %v2166_v0  ;;  %355 = vst.msk [vmem:[#allocation5] sm:$0xff] %vm351_vm0, %v2166_v0 }
  0x8e PF: > { %v1869_v1 = vld [vmem:[#allocation11 + $0x8] sm:$0xff]   ;;  %v2167_v2 = vmov 0.0   ;;  %v1871_v4 = vld [vmem:[#allocation11] sm:$0xff]   ;;  %vm2168_vm1 = vmmov 0   ;;  %vm377_vm2 = vcmask 261120   ;;  %s2169_s18 = smov 32  }
  0x8f   : > { %1700 = vmatprep.subr.bf16.mxu0 %v2167_v2  ;;  %1708 = vmatprep.subr.bf16.mxu1 %v2167_v2  ;;  %v1870_v3 = vld [vmem:[%s2921_s4 + $0x8] sm:$0xff]   ;;  %v1872_v5 = vld [vmem:[%s2921_s4] sm:$0xff]   ;;  %v1609_v13 = vld [vmem:[%s2439_s12 + $0x18] sm:$0xff]  ;;  %s2170_s10 = smov 64   ;;  %v2171_v32 = vmov 0   ;;  %s489_s29 = ssub.s32 2, %s2247_s28 }
  0x90   : > { %1701 = vmatpush3.bf16.msra.mxu0 %v1869_v1  ;;  %1704 = vmatprep.mubr.msk.bf16.mxu0 %vm2168_vm1, %v2167_v2  ;;  %v358_v12 = vld [vmem:[%s2428_s14] sm:$0xff]  ;;  %s2503_s15 = sshll.u32 %s2247_s28, 2  ;;  %s2507_s30 = sshll.u32 %s489_s29, 2  ;;  %v1873_v54 = vld [vmem:[#allocation11 + $0x8] sm:$0xff]  }
  0x91   : > { %1709 = vmatpush3.bf16.msra.mxu1 %v1870_v3  ;;  %1702 = vmatprep.subr.bf16.mxu0 %v2167_v2  ;;  %v451_v33 = vstv %s2503_s15  ;;  %s491_s17 = sadd.s32 3, %s2507_s30  ;;  %v2514_v36 = vld [vmem:[%s2917_s0] sm:$0xff]  ;;  %s2172_s3 = smov 96   ;;  %v1874_v57 = vld [vmem:[%s2921_s4 + $0x8] sm:$0xff]  }
  0x92   : > { %1710 = vmatprep.subr.bf16.mxu1 %v2167_v2  ;;  %1712 = vmatprep.mubr.msk.bf16.mxu1 %vm2168_vm1, %v2167_v2  ;;  %vm452_vm3 = vcmp.lt.s32.totalorder %v451_v33, %v2514_v36  ;;  %v585_v38 = vstv %s491_s17  ;;  %v1875_v58 = vld [vmem:[#allocation11] sm:$0xff]   ;;  %s623_s26 = sadd.s32 1, %s2503_s15  ;;  %s755_s17 = sadd.s32 2, %s2507_s30 }
  0x93   : > { %v2471_v6 = vld [vmem:[#allocation2] sm:$0xff]  ;;  %v2475_v8 = vld [vmem:[#allocation3] sm:$0xff]  ;;  %1868 = vset.pattern.permute.xlu1 %v2171_v32  ;;  %1867 = vset.pattern.permute.xlu0 %v2171_v32  ;;  %v453_v41 = vsel %vm452_vm3, 1, %v2171_v32  ;;  %vm586_vm4 = vcmp.lt.s32.totalorder %v585_v38, %v2514_v36  ;;  %s887_s7 = sadd.s32 2, %s2503_s15  ;;  %s1019_s11 = sadd.s32 1, %s2507_s30 }
  0x94   : > { %v2473_v7 = vld [vmem:[#allocation4] sm:$0xff]  ;;  %v360_v9 = vpack.c.bf16 %v2471_v6, %v2471_v6  ;;  %431 = vrot.lane.b32.xlu1 %v2475_v8, %s2169_s18  ;;  %v2481_v10 = vld [vmem:[#allocation5] sm:$0xff]  ;;  %1703 = vmatpush3.bf16.msra.mxu0 %v1871_v4  ;;  %v587_v43 = vsel %vm586_vm4, 1, %v2171_v32  ;;  %v1876_v61 = vld [vmem:[%s2921_s4] sm:$0xff]   ;;  %vm487_vm4 = vcmask 257024   ;;  %p2971_p5 = scmp.ne.s32.totalorder %s2952_s20, 0 }
  0x95   : > { %v495_v11 = vpack.c.bf16 %v2473_v7, %v2473_v7  ;;  %1711 = vmatpush3.bf16.msra.mxu1 %v1872_v5  ;;  %1716 = vmatprep.subr.bf16.mxu0 %v2167_v2 }
  0x96   : > { %1724 = vmatprep.subr.bf16.mxu1 %v2167_v2 }
  0x97   : > { %1705 = vmatmul.mubr.msk.bf16.vlgmr.msra.gmra.mxu0 %vm377_vm2, %v360_v9 }
  0x98   : > { %565 = vrot.lane.b32.xlu1 %v2481_v10, %s2169_s18  ;;  %1713 = vmatmul.mubr.msk.bf16.vlgmr.msra.gmra.mxu1 %vm377_vm2, %v495_v11 }
  0x99   : > { %1720 = vmatprep.mubr.msk.bf16.mxu0 %vm2168_vm1, %v2167_v2  ;;  %1728 = vmatprep.mubr.msk.bf16.mxu1 %vm2168_vm1, %v2167_v2 }
  0x9a   : > { %1717 = vmatpush3.bf16.msra.mxu0 %v1873_v54  ;;  %1725 = vmatpush3.bf16.msra.mxu1 %v1874_v57 }
  0x9b   : > { %1718 = vmatprep.subr.bf16.mxu0 %v2167_v2  ;;  %1726 = vmatprep.subr.bf16.mxu1 %v2167_v2 }
  0x9e   : > { %1719 = vmatpush3.bf16.msra.mxu0 %v1875_v58  ;;  %1727 = vmatpush3.bf16.msra.mxu1 %v1876_v61 }
  0x9f   : > { %1732 = vmatprep.subr.bf16.mxu0 %v2167_v2  ;;  %1740 = vmatprep.subr.bf16.mxu1 %v2167_v2 }
 0x106   : > { %v432_v44 = vpop.permute.xlu1 %431 }
 0x10a   : > { %v566_v46 = vpop.permute.xlu1 %565 }
 0x157   : > { %v415_v14 = vpop.f32.mrf.mxu0 }
 0x158   : > { %v421_v15 = vadd.f32 %v415_v14, %v358_v12  ;;  %v549_v16 = vpop.f32.mrf.mxu1 }
 0x159   : > { %v555_v17 = vadd.f32 %v1609_v13, %v549_v16  ;;  %v1706_v18 = vpop.f32.mrf.mxu0 }
 0x15a   : > { %1885 = vtanh.f32 %v421_v15  ;;  %v1714_v19 = vpop.f32.mrf.mxu1  ;;  %v1606_v26 = vmul.f32 -1.442695, %v421_v15 }
 0x15b   : > { %v418_v20 = vpop.f32.mrf.mxu0  ;;  %1887 = vtanh.f32 %v555_v17  ;;  %v1613_v27 = vmul.f32 -1.442695, %v555_v17  ;;  %v1616_v17 = vld [vmem:[%s2428_s14 + $0x8] sm:$0xff] }
 0x15c   : > { %v552_v21 = vpop.f32.mrf.mxu1  ;;  %1889 = vpow2.f32 %v1606_v26 }
 0x15d   : > { %v1707_v22 = vpop.f32.mrf.mxu0  ;;  %1891 = vpow2.f32 %v1613_v27  ;;  %v1623_v21 = vld [vmem:[%s2439_s12 + $0x10] sm:$0xff] }
 0x15e   : > { %v1715_v23 = vpop.f32.mrf.mxu1 }
 0x167   : > { %v1886_v24 = vpop.eup %1885 }
 0x168   : > { %436 = vrot.lane.b32.xlu0 %v1886_v24, %s2170_s10  ;;  %v1888_v25 = vpop.eup %1887 }
 0x169   : > { %v1890_v28 = vpop.eup %1889 }
 0x16a   : > { %v425_v29 = vadd.f32 1.0, %v1890_v28  ;;  %v1892_v30 = vpop.eup %1891 }
 0x16b   : > { %v559_v31 = vadd.f32 1.0, %v1892_v30 }
 0x16c   : > { %570 = vrot.lane.b32.xlu0 %v1888_v25, %s2170_s10  ;;  %1893 = vrcp.f32 %v425_v29 }
 0x16d   : > { %1895 = vrcp.f32 %v559_v31 }
 0x179   : > { %v1894_v34 = vpop.eup %1893 }
 0x17a   : > { %v1896_v39 = vpop.eup %1895  ;;  %v434_v45 = vmul.f32 %v1894_v34, %v432_v44 }
 0x17b   : > { %v568_v49 = vmul.f32 %v1896_v39, %v566_v46 }
 0x1da   : > { %v437_v35 = vpop.permute.xlu0 %436 }
 0x1db   : > { %v439_v37 = vmul.f32 %v1894_v34, %v437_v35 }
 0x1dd   : > { %441 = vrot.lane.b32.xlu0 %v439_v37, %s2169_s18 }
 0x1de   : > { %v571_v40 = vpop.permute.xlu0 %570 }
 0x1df   : > { %v573_v42 = vmul.f32 %v1896_v39, %v571_v40 }
 0x1e1   : > { %575 = vrot.lane.b32.xlu1 %v573_v42, %s2169_s18  ;;  %455 = vperm.xlu0 %1867, %v453_v41   ;;  %v717_v41 = vstv %s623_s26 }
 0x1e2   : > { %vm718_vm7 = vcmp.lt.s32.totalorder %v717_v41, %v2514_v36 }
 0x1e5   : > { %589 = vperm.xlu1 %1868, %v587_v43  }
 0x24f   : > { %v442_v47 = vpop.permute.xlu0 %441 }
 0x250   : > { %v444_v48 = vadd.f32 %v442_v47, %v434_v45  ;;  %v849_v45 = vstv %s755_s17 }
 0x251   : > { %vm850_vm8 = vcmp.lt.s32.totalorder %v849_v45, %v2514_v36 }
 0x252   : > { %1897 = vtanh.f32 %v444_v48 }
 0x253   : > { %v576_v50 = vpop.permute.xlu1 %575 }
 0x254   : > { %v578_v51 = vadd.f32 %v576_v50, %v568_v49  ;;  %v851_v50 = vsel %vm850_vm8, 1, %v2171_v32 }
 0x256   : > { %1899 = vtanh.f32 %v578_v51 }
 0x25c   : > { %v2531_v56 = vpop.permute.xlu0 %455 }
 0x25d   : > { %vm457_vm5 = vcmp.eq.s32.totalorder %v2531_v56, 1 }
 0x25f   : > { %v1898_v52 = vpop.eup %1897 }
 0x260   : > { %447 = vrot.lane.b32.xlu1 %v1898_v52, %s2170_s10  ;;  %v2528_v55 = vpop.permute.xlu1 %589 }
 0x261   : > { %vm591_vm6 = vcmp.eq.s32.totalorder %v2528_v55, 1 }
 0x263   : > { %v1900_v53 = vpop.eup %1899 }
 0x264   : > { %459 = vrot.lane.b32.xlu1 %v2471_v6, %s2172_s3  ;;  %581 = vrot.lane.b32.xlu0 %v1900_v53, %s2170_s10 }
 0x268   : > { %593 = vrot.lane.b32.xlu0 %v2473_v7, %s2172_s3 }
 0x2d2   : > { %v448_v59 = vpop.permute.xlu1 %447 }
 0x2d3   : > { %v2538_v60 = vmul.f32 %v1894_v34, %v448_v59 }
 0x2d6   : > { %v460_v62 = vpop.permute.xlu1 %459  ;;  %v582_v63 = vpop.permute.xlu0 %581 }
 0x2d7   : > { %v462_v0 = vsel %vm457_vm5, %v2538_v60, %v460_v62  ;;  %v2549_v1 = vmul.f32 %v1896_v39, %v582_v63 }
 0x2d8   : > { %464 = vrot.lane.b32.xlu1 %v462_v0, %s2169_s18  ;;  %v1877_v0 = vld [vmem:[#allocation11 + $0x8] sm:$0xff]  }
 0x2da   : > { %v594_v3 = vpop.permute.xlu0 %593 }
 0x2db   : > { %v596_v4 = vsel %vm591_vm6, %v2549_v1, %v594_v3 }
 0x2dc   : > { %470 = vrot.lane.b32.xlu1 %v2475_v8, %s2169_s18  ;;  %598 = vrot.lane.b32.xlu0 %v596_v4, %s2169_s18  ;;  %v1878_v4 = vld [vmem:[%s2921_s4 + $0x8] sm:$0xff]  }
 0x2e0   : > { %604 = vrot.lane.b32.xlu0 %v2481_v10, %s2169_s18 }
 0x34a   : > { %v465_v5 = vpop.permute.xlu1 %464 }
 0x34b   : > { %467 = vst.msk [vmem:[#allocation2] sm:$0xff] %vm377_vm2, %v465_v5  ;;  %v1879_v5 = vld [vmem:[#allocation11] sm:$0xff]  }
 0x34e   : > { %v471_v6 = vpop.permute.xlu1 %470  ;;  %v599_v7 = vpop.permute.xlu0 %598 }
 0x34f   : > { %601 = vst.msk [vmem:[#allocation4] sm:$0xff] %vm377_vm2, %v599_v7  ;;  %v473_v9 = vsel %vm457_vm5, %v444_v48, %v471_v6  ;;  %v719_v48 = vsel %vm718_vm7, 1, %v2171_v32 }
 0x350   : > { %475 = vrot.lane.b32.xlu1 %v473_v9, %s2172_s3 }
 0x352   : > { %v605_v11 = vpop.permute.xlu0 %604  ;;  %v2565_v8 = vld [vmem:[#allocation2] sm:$0xff] }
 0x353   : > { %v607_v12 = vsel %vm591_vm6, %v578_v51, %v605_v11  ;;  %v627_v10 = vpack.c.bf16 %v2565_v8, %v2565_v8  ;;  %v1880_v11 = vld [vmem:[%s2921_s4] sm:$0xff]  }
 0x354   : > { %609 = vrot.lane.b32.xlu0 %v607_v12, %s2172_s3 }
 0x355   : > { %1721 = vmatmul.mubr.msk.bf16.vlgmr.msra.gmra.mxu0 %vm377_vm2, %v627_v10 }
 0x356   : > { %v2573_v13 = vld [vmem:[#allocation4] sm:$0xff]  ;;  %1736 = vmatprep.mubr.msk.bf16.mxu0 %vm2168_vm1, %v2167_v2  ;;  %1733 = vmatpush3.bf16.msra.mxu0 %v1877_v0 }
 0x357   : > { %v759_v14 = vpack.c.bf16 %v2573_v13, %v2573_v13  ;;  %1734 = vmatprep.subr.bf16.mxu0 %v2167_v2 }
 0x359   : > { %1729 = vmatmul.mubr.msk.bf16.vlgmr.msra.gmra.mxu1 %vm377_vm2, %v759_v14 }
 0x35a   : > { %1744 = vmatprep.mubr.msk.bf16.mxu1 %vm2168_vm1, %v2167_v2  ;;  %1741 = vmatpush3.bf16.msra.mxu1 %v1878_v4 }
 0x35b   : > { %1735 = vmatpush3.bf16.msra.mxu0 %v1879_v5  ;;  %1742 = vmatprep.subr.bf16.mxu1 %v2167_v2 }
 0x35c   : > { %1748 = vmatprep.subr.bf16.mxu0 %v2167_v2 }
 0x35e   : > { %1743 = vmatpush3.bf16.msra.mxu1 %v1880_v11 }
 0x35f   : > { %1756 = vmatprep.subr.bf16.mxu1 %v2167_v2 }
 0x3c2   : > { %v476_v15 = vpop.permute.xlu1 %475 }
 0x3c3   : > { %478 = vst.msk [vmem:[#allocation3] sm:$0xff] %vm377_vm2, %v476_v15 }
 0x3c6   : > { %v610_v16 = vpop.permute.xlu0 %609 }
 0x3c7   : > { %612 = vst.msk [vmem:[#allocation5] sm:$0xff] %vm377_vm2, %v610_v16 }
 0x3ca   : > { %v2587_v31 = vld [vmem:[#allocation3] sm:$0xff] }
 0x3ce   : > { %v2592_v33 = vld [vmem:[#allocation5] sm:$0xff] }
 0x415   : > { %v681_v18 = vpop.f32.mrf.mxu0 }
 0x416   : > { %v687_v19 = vadd.f32 %v1616_v17, %v681_v18 }
 0x417   : > { %v1722_v20 = vpop.f32.mrf.mxu0 }
 0x418   : > { %1901 = vtanh.f32 %v687_v19  ;;  %v1620_v34 = vmul.f32 -1.442695, %v687_v19 }
 0x419   : > { %v684_v22 = vpop.f32.mrf.mxu0  ;;  %v813_v23 = vpop.f32.mrf.mxu1 }
 0x41a   : > { %v819_v24 = vadd.f32 %v1623_v21, %v813_v23 }
 0x41b   : > { %v1723_v25 = vpop.f32.mrf.mxu0  ;;  %v1730_v26 = vpop.f32.mrf.mxu1 }
 0x41c   : > { %1903 = vtanh.f32 %v819_v24  ;;  %v1627_v35 = vmul.f32 -1.442695, %v819_v24 }
 0x41d   : > { %v816_v27 = vpop.f32.mrf.mxu1  ;;  %1905 = vpow2.f32 %v1620_v34 }
 0x41e   : > { %1907 = vpow2.f32 %v1627_v35 }
 0x41f   : > { %v1731_v28 = vpop.f32.mrf.mxu1 }
 0x420   : > { %v1630_v28 = vld [vmem:[%s2428_s14 + $0x10] sm:$0xff] }
 0x425   : > { %v1902_v29 = vpop.eup %1901 }
 0x426   : > { %702 = vrot.lane.b32.xlu1 %v1902_v29, %s2170_s10 }
 0x429   : > { %v1904_v30 = vpop.eup %1903 }
 0x42a   : > { %697 = vrot.lane.b32.xlu1 %v2587_v31, %s2169_s18  ;;  %834 = vrot.lane.b32.xlu0 %v1904_v30, %s2170_s10  ;;  %v1906_v37 = vpop.eup %1905 }
 0x42b   : > { %v691_v38 = vadd.f32 1.0, %v1906_v37  ;;  %v1908_v39 = vpop.eup %1907 }
 0x42c   : > { %v823_v40 = vadd.f32 1.0, %v1908_v39 }
 0x42d   : > { %1909 = vrcp.f32 %v691_v38 }
 0x42e   : > { %829 = vrot.lane.b32.xlu0 %v2592_v33, %s2169_s18  ;;  %1911 = vrcp.f32 %v823_v40 }
 0x43a   : > { %v1910_v42 = vpop.eup %1909 }
 0x43b   : > { %v1912_v46 = vpop.eup %1911 }
 0x498   : > { %v703_v43 = vpop.permute.xlu1 %702 }
 0x499   : > { %v705_v44 = vmul.f32 %v1910_v42, %v703_v43 }
 0x49b   : > { %707 = vrot.lane.b32.xlu1 %v705_v44, %s2169_s18 }
 0x49c   : > { %v835_v47 = vpop.permute.xlu0 %834  ;;  %v698_v51 = vpop.permute.xlu1 %697 }
 0x49d   : > { %v837_v49 = vmul.f32 %v1912_v46, %v835_v47  ;;  %v700_v52 = vmul.f32 %v1910_v42, %v698_v51 }
 0x49f   : > { %721 = vperm.xlu1 %1868, %v719_v48   ;;  %839 = vrot.lane.b32.xlu0 %v837_v49, %s2169_s18 }
 0x4a0   : > { %v830_v53 = vpop.permute.xlu0 %829 }
 0x4a1   : > { %v832_v58 = vmul.f32 %v1912_v46, %v830_v53 }
 0x4a3   : > { %853 = vperm.xlu0 %1867, %v851_v50  }
 0x50d   : > { %v708_v54 = vpop.permute.xlu1 %707 }
 0x50e   : > { %v710_v57 = vadd.f32 %v708_v54, %v700_v52  ;;  %v981_v52 = vstv %s887_s7 }
 0x50f   : > { %vm982_vm11 = vcmp.lt.s32.totalorder %v981_v52, %v2514_v36 }
 0x510   : > { %1913 = vtanh.f32 %v710_v57 }
 0x511   : > { %v840_v59 = vpop.permute.xlu0 %839 }
 0x512   : > { %v842_v61 = vadd.f32 %v840_v59, %v832_v58  ;;  %v1113_v58 = vstv %s1019_s11 }
 0x513   : > { %vm1114_vm12 = vcmp.lt.s32.totalorder %v1113_v58, %v2514_v36 }
 0x514   : > { %1915 = vtanh.f32 %v842_v61  ;;  %v1115_v0 = vsel %vm1114_vm12, 1, %v2171_v32 }
 0x51a   : > { %v2610_v3 = vpop.permute.xlu1 %721 }
 0x51b   : > { %vm723_vm9 = vcmp.eq.s32.totalorder %v2610_v3, 1 }
 0x51d   : > { %v1914_v62 = vpop.eup %1913 }
 0x51e   : > { %713 = vrot.lane.b32.xlu1 %v1914_v62, %s2170_s10  ;;  %v2616_v6 = vpop.permute.xlu0 %853  ;;  %v983_v62 = vsel %vm982_vm11, 1, %v2171_v32 }
 0x51f   : > { %vm855_vm10 = vcmp.eq.s32.totalorder %v2616_v6, 1 }
 0x521   : > { %v1916_v63 = vpop.eup %1915 }
 0x522   : > { %725 = vrot.lane.b32.xlu1 %v2565_v8, %s2172_s3  ;;  %845 = vrot.lane.b32.xlu0 %v1916_v63, %s2170_s10 }
 0x526   : > { %857 = vrot.lane.b32.xlu0 %v2573_v13, %s2172_s3 }
 0x590   : > { %v714_v7 = vpop.permute.xlu1 %713 }
 0x591   : > { %v2620_v9 = vmul.f32 %v1910_v42, %v714_v7 }
 0x594   : > { %v726_v8 = vpop.permute.xlu1 %725  ;;  %v846_v12 = vpop.permute.xlu0 %845 }
 0x595   : > { %v728_v10 = vsel %vm723_vm9, %v2620_v9, %v726_v8  ;;  %v2631_v13 = vmul.f32 %v1912_v46, %v846_v12 }
 0x596   : > { %730 = vrot.lane.b32.xlu1 %v728_v10, %s2169_s18 }
 0x598   : > { %v858_v14 = vpop.permute.xlu0 %857 }
 0x599   : > { %v860_v15 = vsel %vm855_vm10, %v2631_v13, %v858_v14 }
 0x59a   : > { %736 = vrot.lane.b32.xlu1 %v2587_v31, %s2169_s18  ;;  %862 = vrot.lane.b32.xlu0 %v860_v15, %s2169_s18 }
 0x59e   : > { %868 = vrot.lane.b32.xlu0 %v2592_v33, %s2169_s18  ;;  %v1637_v33 = vld [vmem:[%s2439_s12 + $0x8] sm:$0xff] }
 0x608   : > { %v731_v16 = vpop.permute.xlu1 %730 }
 0x609   : > { %733 = vst.msk [vmem:[#allocation2] sm:$0xff] %vm377_vm2, %v731_v16 }
 0x60c   : > { %v737_v17 = vpop.permute.xlu1 %736  ;;  %v863_v18 = vpop.permute.xlu0 %862 }
 0x60d   : > { %865 = vst.msk [vmem:[#allocation4] sm:$0xff] %vm377_vm2, %v863_v18  ;;  %v739_v19 = vsel %vm723_vm9, %v710_v57, %v737_v17  ;;  %v1881_v17 = vld [vmem:[#allocation11 + $0x8] sm:$0xff]  }
 0x60e   : > { %741 = vrot.lane.b32.xlu1 %v739_v19, %s2172_s3  ;;  %v1882_v19 = vld [vmem:[%s2921_s4 + $0x8] sm:$0xff]  }
 0x610   : > { %v869_v20 = vpop.permute.xlu0 %868  ;;  %v2647_v21 = vld [vmem:[#allocation2] sm:$0xff] }
 0x611   : > { %v871_v22 = vsel %vm855_vm10, %v842_v61, %v869_v20  ;;  %v891_v23 = vpack.c.bf16 %v2647_v21, %v2647_v21  ;;  %v1883_v20 = vld [vmem:[#allocation11] sm:$0xff]  }
 0x612   : > { %873 = vrot.lane.b32.xlu0 %v871_v22, %s2172_s3 }
 0x613   : > { %1737 = vmatmul.mubr.msk.bf16.vlgmr.msra.gmra.mxu0 %vm377_vm2, %v891_v23 }
 0x614   : > { %v2655_v24 = vld [vmem:[#allocation4] sm:$0xff]  ;;  %1752 = vmatprep.mubr.msk.bf16.mxu0 %vm2168_vm1, %v2167_v2  ;;  %1749 = vmatpush3.bf16.msra.mxu0 %v1881_v17 }
 0x615   : > { %v1023_v25 = vpack.c.bf16 %v2655_v24, %v2655_v24  ;;  %1750 = vmatprep.subr.bf16.mxu0 %v2167_v2 }
 0x617   : > { %1745 = vmatmul.mubr.msk.bf16.vlgmr.msra.gmra.mxu1 %vm377_vm2, %v1023_v25 }
 0x618   : > { %1760 = vmatprep.mubr.msk.bf16.mxu1 %vm2168_vm1, %v2167_v2  ;;  %1757 = vmatpush3.bf16.msra.mxu1 %v1882_v19 }
 0x619   : > { %1751 = vmatpush3.bf16.msra.mxu0 %v1883_v20  ;;  %1758 = vmatprep.subr.bf16.mxu1 %v2167_v2 }
 0x680   : > { %v742_v26 = vpop.permute.xlu1 %741 }
 0x681   : > { %744 = vst.msk [vmem:[#allocation3] sm:$0xff] %vm377_vm2, %v742_v26 }
 0x684   : > { %v874_v27 = vpop.permute.xlu0 %873 }
 0x685   : > { %876 = vst.msk [vmem:[#allocation5] sm:$0xff] %vm377_vm2, %v874_v27 }
 0x688   : > { %v2669_v44 = vld [vmem:[#allocation3] sm:$0xff] }
 0x68c   : > { %v2674_v45 = vld [vmem:[#allocation5] sm:$0xff] }
 0x6d3   : > { %v945_v29 = vpop.f32.mrf.mxu0 }
 0x6d4   : > { %v951_v30 = vadd.f32 %v1630_v28, %v945_v29 }
 0x6d5   : > { %v1738_v31 = vpop.f32.mrf.mxu0 }
 0x6d6   : > { %1917 = vtanh.f32 %v951_v30  ;;  %v1634_v46 = vmul.f32 -1.442695, %v951_v30 }
 0x6d7   : > { %v948_v34 = vpop.f32.mrf.mxu0  ;;  %v1077_v35 = vpop.f32.mrf.mxu1 }
 0x6d8   : > { %v1083_v37 = vadd.f32 %v1637_v33, %v1077_v35 }
 0x6d9   : > { %v1739_v38 = vpop.f32.mrf.mxu0  ;;  %v1746_v39 = vpop.f32.mrf.mxu1 }
 0x6da   : > { %1919 = vtanh.f32 %v1083_v37  ;;  %v1641_v47 = vmul.f32 -1.442695, %v1083_v37 }
 0x6db   : > { %v1080_v40 = vpop.f32.mrf.mxu1  ;;  %1921 = vpow2.f32 %v1634_v46 }
 0x6dc   : > { %1923 = vpow2.f32 %v1641_v47 }
 0x6dd   : > { %v1747_v41 = vpop.f32.mrf.mxu1 }
 0x6e3   : > { %v1918_v42 = vpop.eup %1917 }
 0x6e4   : > { %966 = vrot.lane.b32.xlu1 %v1918_v42, %s2170_s10 }
 0x6e7   : > { %v1920_v43 = vpop.eup %1919 }
 0x6e8   : > { %961 = vrot.lane.b32.xlu1 %v2669_v44, %s2169_s18  ;;  %1098 = vrot.lane.b32.xlu0 %v1920_v43, %s2170_s10  ;;  %v1922_v48 = vpop.eup %1921 }
 0x6e9   : > { %v955_v49 = vadd.f32 1.0, %v1922_v48  ;;  %v1924_v50 = vpop.eup %1923  ;;  %v1283_v48 = vld [vmem:[%s2439_s12] sm:$0xff]  ;;  %s1674_s12 = sshll.u32 %s2247_s28, 8 }
 0x6ea   : > { %v1087_v51 = vadd.f32 1.0, %v1924_v50  ;;  %s2817_s26 = scalar_lea.hbm %s2922_s5, %s1674_s12  ;;  %s2173_s12 = smov [#allocation12]  }
 0x6eb   : > { %1925 = vrcp.f32 %v955_v49 }
 0x6ec   : > { %1093 = vrot.lane.b32.xlu0 %v2674_v45, %s2169_s18  ;;  %1927 = vrcp.f32 %v1087_v51 }
 0x6f8   : > { %v1926_v53 = vpop.eup %1925 }
 0x6f9   : > { %v1928_v59 = vpop.eup %1927 }
 0x756   : > { %v967_v54 = vpop.permute.xlu1 %966 }
 0x757   : > { %v969_v57 = vmul.f32 %v1926_v53, %v967_v54 }
 0x759   : > { %971 = vrot.lane.b32.xlu1 %v969_v57, %s2169_s18 }
 0x75a   : > { %v1099_v61 = vpop.permute.xlu0 %1098  ;;  %v962_v4 = vpop.permute.xlu1 %961 }
 0x75b   : > { %v1101_v63 = vmul.f32 %v1928_v59, %v1099_v61  ;;  %v964_v5 = vmul.f32 %v1926_v53, %v962_v4 }
 0x75d   : > { %985 = vperm.xlu1 %1868, %v983_v62   ;;  %1103 = vrot.lane.b32.xlu0 %v1101_v63, %s2169_s18 }
 0x75e   : > { %v1094_v7 = vpop.permute.xlu0 %1093 }
 0x75f   : > { %v1096_v12 = vmul.f32 %v1928_v59, %v1094_v7 }
 0x761   : > { %1117 = vperm.xlu0 %1867, %v1115_v0  }
 0x7cb   : > { %v972_v11 = vpop.permute.xlu1 %971 }
 0x7cc   : > { %v974_v8 = vadd.f32 %v972_v11, %v964_v5 }
 0x7ce   : > { %1929 = vtanh.f32 %v974_v8 }
 0x7cf   : > { %v1104_v10 = vpop.permute.xlu0 %1103 }
 0x7d0   : > { %v1106_v14 = vadd.f32 %v1104_v10, %v1096_v12 }
 0x7d2   : > { %1931 = vtanh.f32 %v1106_v14 }
 0x7d8   : > { %v2692_v18 = vpop.permute.xlu1 %985 }
 0x7d9   : > { %vm987_vm13 = vcmp.eq.s32.totalorder %v2692_v18, 1 }
 0x7db   : > { %v1930_v15 = vpop.eup %1929 }
 0x7dc   : > { %977 = vrot.lane.b32.xlu1 %v1930_v15, %s2170_s10  ;;  %v2698_v22 = vpop.permute.xlu0 %1117  ;;  %v1375_v15 = vstv %s2507_s30  ;;  %s2035_s30 = sshll.u32 %s2173_s12, 4  ;;  %s2036_s30 = int_to_ptr.vmem [resolvable:$false] %s2035_s30 }
 0x7dd   : > { %vm1119_vm14 = vcmp.eq.s32.totalorder %v2698_v22, 1  ;;  %vm1376_vm0 = vcmp.lt.s32.totalorder %v1375_v15, %v2514_v36 }
 0x7df   : > { %v1932_v16 = vpop.eup %1931 }
 0x7e0   : > { %989 = vrot.lane.b32.xlu1 %v2647_v21, %s2172_s3  ;;  %1109 = vrot.lane.b32.xlu0 %v1932_v16, %s2170_s10 }
 0x7e4   : > { %1121 = vrot.lane.b32.xlu0 %v2655_v24, %s2172_s3  ;;  %v1884_v24 = vld [vmem:[%s2921_s4] sm:$0xff]  }
 0x7e5   : > { %1759 = vmatpush3.bf16.msra.mxu1 %v1884_v24 }
 0x84e   : > { %v978_v23 = vpop.permute.xlu1 %977 }
 0x84f   : > { %v2701_v21 = vmul.f32 %v1926_v53, %v978_v23  ;;  %v1377_v23 = vsel %vm1376_vm0, 1, %v2171_v32 }
 0x852   : > { %v990_v25 = vpop.permute.xlu1 %989  ;;  %v1110_v26 = vpop.permute.xlu0 %1109 }
 0x853   : > { %v992_v27 = vsel %vm987_vm13, %v2701_v21, %v990_v25  ;;  %v2711_v28 = vmul.f32 %v1928_v59, %v1110_v26 }
 0x854   : > { %994 = vrot.lane.b32.xlu1 %v992_v27, %s2169_s18 }
 0x855   : > { %v1141_v3 = vsel %vm1119_vm14, %v2711_v28, 0.0 }
 0x856   : > { %v1122_v2 = vpop.permute.xlu0 %1121  ;;  %v1671_v6 = vpack.c.bf16 %v1141_v3, %v1141_v3 }
 0x857   : > { %v1124_v29 = vsel %vm1119_vm14, %v2711_v28, %v1122_v2 }
 0x858   : > { %1000 = vrot.lane.b32.xlu1 %v2669_v44, %s2169_s18  ;;  %1126 = vrot.lane.b32.xlu0 %v1124_v29, %s2169_s18  ;;  %v1644_v44 = vld [vmem:[%s2428_s14 + $0x18] sm:$0xff]  ;;  %s1151_s14 = sadd.s32 3, %s2503_s15  ;;  %s1675_s15 = sshll.u32 %s489_s29, 8 }
 0x859   : > { %s2825_s28 = scalar_lea.hbm %s2923_s6, %s1675_s15  ;;  %s1413_s29 = scalar_lea.sflag [#allocation8], %s2424_s21 }
 0x85c   : > { %1132 = vrot.lane.b32.xlu0 %v2674_v45, %s2169_s18 }
 0x8c6   : > { %v995_v30 = vpop.permute.xlu1 %994 }
 0x8c7   : > { %997 = vst.msk [vmem:[#allocation2] sm:$0xff] %vm377_vm2, %v995_v30 }
 0x8ca   : > { %v1001_v31 = vpop.permute.xlu1 %1000  ;;  %v1127_v33 = vpop.permute.xlu0 %1126 }
 0x8cb   : > { %1129 = vst.msk [vmem:[#allocation4] sm:$0xff] %vm377_vm2, %v1127_v33  ;;  %v1003_v34 = vsel %vm987_vm13, %v974_v8, %v1001_v31  ;;  %v1245_v8 = vstv %s1151_s14 }
 0x8cc   : > { %1005 = vrot.lane.b32.xlu1 %v1003_v34, %s2172_s3  ;;  %vm1246_vm15 = vcmp.lt.s32.totalorder %v1245_v8, %v2514_v36 }
 0x8cd   : > { %v1247_v19 = vsel %vm1246_vm15, 1, %v2171_v32  ;;  %v479_v32 = vsel %vm457_vm5, %v2538_v60, 0.0 }
 0x8ce   : > { %v1133_v35 = vpop.permute.xlu0 %1132  ;;  %v2727_v37 = vld [vmem:[#allocation2] sm:$0xff]  ;;  %v1666_v34 = vpack.c.bf16 %v479_v32, %v479_v32 }
 0x8cf   : > { %v1135_v38 = vsel %vm1119_vm14, %v1106_v14, %v1133_v35  ;;  %v1155_v39 = vpack.c.bf16 %v2727_v37, %v2727_v37  ;;  %v613_v35 = vsel %vm591_vm6, %v2549_v1, 0.0 }
 0x8d0   : > { %1137 = vrot.lane.b32.xlu0 %v1135_v38, %s2172_s3  ;;  %v1667_v56 = vpack.c.bf16 %v613_v35, %v613_v35  ;;  %v877_v38 = vsel %vm855_vm10, %v2631_v13, 0.0 }
 0x8d1   : > { %1753 = vmatmul.mubr.msk.bf16.vlgmr.msra.gmra.mxu0 %vm377_vm2, %v1155_v39  ;;  %v1009_v39 = vsel %vm987_vm13, %v2701_v21, 0.0  ;;  %v1669_v55 = vpack.c.bf16 %v877_v38, %v877_v38 }
 0x8d2   : > { %v2735_v40 = vld [vmem:[#allocation4] sm:$0xff]  ;;  %v1670_v1 = vpack.c.bf16 %v1009_v39, %v1009_v39 }
 0x8d3   : > { %v1285_v41 = vpack.c.bf16 %v2735_v40, %v2735_v40 }
 0x8d5   : > { %1761 = vmatmul.mubr.msk.bf16.vlgmr.msra.gmra.mxu1 %vm377_vm2, %v1285_v41 }
 0x93e   : > { %v1006_v42 = vpop.permute.xlu1 %1005 }
 0x93f   : > { %1008 = vst.msk [vmem:[#allocation3] sm:$0xff] %vm377_vm2, %v1006_v42 }
 0x942   : > { %v1138_v43 = vpop.permute.xlu0 %1137 }
 0x943   : > { %1140 = vst.msk [vmem:[#allocation5] sm:$0xff] %vm377_vm2, %v1138_v43 }
 0x946   : > { %v1223_v61 = vld [vmem:[#allocation3] sm:$0xff] }
 0x94a   : > { %v1353_v62 = vld [vmem:[#allocation5] sm:$0xff] }
 0x991   : > { %v1209_v45 = vpop.f32.mrf.mxu0 }
 0x992   : > { %v1215_v46 = vadd.f32 %v1644_v44, %v1209_v45 }
 0x993   : > { %v1754_v47 = vpop.f32.mrf.mxu0 }
 0x994   : > { %1933 = vtanh.f32 %v1215_v46  ;;  %v1648_v63 = vmul.f32 -1.442695, %v1215_v46 }
 0x995   : > { %v1212_v49 = vpop.f32.mrf.mxu0  ;;  %v1339_v50 = vpop.f32.mrf.mxu1 }
 0x996   : > { %v1345_v51 = vadd.f32 %v1339_v50, %v1283_v48 }
 0x997   : > { %v1755_v52 = vpop.f32.mrf.mxu0  ;;  %v1762_v53 = vpop.f32.mrf.mxu1 }
 0x998   : > { %1935 = vtanh.f32 %v1345_v51  ;;  %v1654_v0 = vmul.f32 -1.442695, %v1345_v51 }
 0x999   : > { %v1342_v54 = vpop.f32.mrf.mxu1  ;;  %1937 = vpow2.f32 %v1648_v63 }
 0x99a   : > { %1939 = vpow2.f32 %v1654_v0 }
 0x99b   : > { %v1763_v57 = vpop.f32.mrf.mxu1 }
 0x9a1   : > { %v1934_v58 = vpop.eup %1933 }
 0x9a2   : > { %1230 = vrot.lane.b32.xlu1 %v1934_v58, %s2170_s10 }
 0x9a5   : > { %v1936_v59 = vpop.eup %1935 }
 0x9a6   : > { %1225 = vrot.lane.b32.xlu1 %v1223_v61, %s2169_s18  ;;  %1360 = vrot.lane.b32.xlu0 %v1936_v59, %s2170_s10  ;;  %v1938_v4 = vpop.eup %1937 }
 0x9a7   : > { %v1219_v5 = vadd.f32 1.0, %v1938_v4  ;;  %v1940_v7 = vpop.eup %1939 }
 0x9a8   : > { %v1349_v11 = vadd.f32 1.0, %v1940_v7 }
 0x9a9   : > { %1941 = vrcp.f32 %v1219_v5 }
 0x9aa   : > { %1355 = vrot.lane.b32.xlu0 %v1353_v62, %s2169_s18  ;;  %1943 = vrcp.f32 %v1349_v11 }
 0x9b6   : > { %v1942_v12 = vpop.eup %1941 }
 0x9b7   : > { %v1944_v16 = vpop.eup %1943 }
 0xa14   : > { %v1231_v10 = vpop.permute.xlu1 %1230 }
 0xa15   : > { %v1233_v14 = vmul.f32 %v1942_v12, %v1231_v10 }
 0xa17   : > { %1235 = vrot.lane.b32.xlu1 %v1233_v14, %s2169_s18 }
 0xa18   : > { %v1361_v17 = vpop.permute.xlu0 %1360  ;;  %v1226_v24 = vpop.permute.xlu1 %1225 }
 0xa19   : > { %v1363_v20 = vmul.f32 %v1944_v16, %v1361_v17  ;;  %v1228_v25 = vmul.f32 %v1942_v12, %v1226_v24 }
 0xa1b   : > { %1249 = vperm.xlu1 %1868, %v1247_v19   ;;  %1365 = vrot.lane.b32.xlu0 %v1363_v20, %s2169_s18 }
 0xa1c   : > { %v1356_v26 = vpop.permute.xlu0 %1355 }
 0xa1d   : > { %v1358_v29 = vmul.f32 %v1944_v16, %v1356_v26 }
 0xa1f   : > { %1379 = vperm.xlu0 %1867, %v1377_v23  }
 0xa89   : > { %v1236_v27 = vpop.permute.xlu1 %1235 }
 0xa8a   : > { %v1238_v2 = vadd.f32 %v1236_v27, %v1228_v25 }
 0xa8c   : > { %1945 = vtanh.f32 %v1238_v2 }
 0xa8d   : > { %v1366_v30 = vpop.permute.xlu0 %1365 }
 0xa8e   : > { %v1368_v31 = vadd.f32 %v1366_v30, %v1358_v29 }
 0xa90   : > { %1947 = vtanh.f32 %v1368_v31 }
 0xa99   : > { %v1946_v33 = vpop.eup %1945 }
 0xa9a   : > { %1241 = vrot.lane.b32.xlu1 %v1946_v33, %s2170_s10  ;;  %v1380_v13 = vpop.permute.xlu0 %1379 }
 0xa9b   : > { %vm1381_vm3 = vcmp.eq.s32.totalorder %v1380_v13, 1 }
 0xa9d   : > { %v1948_v36 = vpop.eup %1947 }
 0xa9e   : > { %1253 = vrot.lane.b32.xlu1 %v2727_v37, %s2172_s3  ;;  %1371 = vrot.lane.b32.xlu0 %v1948_v36, %s2170_s10  ;;  %v745_v37 = vsel %vm723_vm9, %v2620_v9, 0.0  ;;  %v1250_v9 = vpop.permute.xlu1 %1249 }
 0xa9f   : > { %v1668_v60 = vpack.c.bf16 %v745_v37, %v745_v37  ;;  %vm1251_vm1 = vcmp.eq.s32.totalorder %v1250_v9, 1 }
 0xaa2   : > { %1383 = vrot.lane.b32.xlu1 %v2735_v40, %s2172_s3  ;;  %1264 = vrot.lane.b32.xlu0 %v1223_v61, %s2169_s18 }
 0xaa6   : > { %484 = vrot.lane.b32.xlu1 %v1666_v34, %s2169_s18  ;;  %1394 = vrot.lane.b32.xlu0 %v1353_v62, %s2169_s18 }
 0xaaa   : > { %750 = vrot.lane.b32.xlu1 %v1668_v60, %s2169_s18  ;;  %618 = vrot.lane.b32.xlu0 %v1667_v56, %s2169_s18 }
 0xaae   : > { %1014 = vrot.lane.b32.xlu1 %v1670_v1, %s2169_s18  ;;  %882 = vrot.lane.b32.xlu0 %v1669_v55, %s2169_s18 }
 0xab2   : > { %1146 = vrot.lane.b32.xlu0 %v1671_v6, %s2169_s18 }
 0xb0c   : > { %v1242_v18 = vpop.permute.xlu1 %1241 }
 0xb0d   : > { %v1244_v21 = vmul.f32 %v1942_v12, %v1242_v18 }
 0xb0f   : > { %v1273_v42 = vsel %vm1251_vm1, %v1244_v21, 0.0 }
 0xb10   : > { %v1254_v40 = vpop.permute.xlu1 %1253  ;;  %v1372_v41 = vpop.permute.xlu0 %1371  ;;  %v1672_v22 = vpack.c.bf16 %v1273_v42, %v1273_v42 }
 0xb11   : > { %v1374_v43 = vmul.f32 %v1944_v16, %v1372_v41  ;;  %v1256_v44 = vsel %vm1251_vm1, %v1244_v21, %v1254_v40 }
 0xb12   : > { %1258 = vrot.lane.b32.xlu1 %v1256_v44, %s2169_s18 }
 0xb13   : > { %v1403_v46 = vsel %vm1381_vm3, %v1374_v43, 0.0 }
 0xb14   : > { %v1384_v28 = vpop.permute.xlu1 %1383  ;;  %v1265_v45 = vpop.permute.xlu0 %1264  ;;  %v1673_v48 = vpack.c.bf16 %v1403_v46, %v1403_v46 }
 0xb15   : > { %v1267_v47 = vsel %vm1251_vm1, %v1238_v2, %v1265_v45  ;;  %v1386_v51 = vsel %vm1381_vm3, %v1374_v43, %v1384_v28 }
 0xb16   : > { %1278 = vrot.lane.b32.xlu1 %v1672_v22, %s2169_s18  ;;  %1269 = vrot.lane.b32.xlu0 %v1267_v47, %s2172_s3 }
 0xb18   : > { %v485_v49 = vpop.permute.xlu1 %484  ;;  %v1395_v50 = vpop.permute.xlu0 %1394 }
 0xb19   : > { %488 = vst.msk [vmem:[%s2451_s1] sm:$0xf] %vm487_vm4, %v485_v49  ;;  %v1397_v54 = vsel %vm1381_vm3, %v1368_v31, %v1395_v50 }
 0xb1a   : > { %1388 = vrot.lane.b32.xlu1 %v1386_v51, %s2169_s18  ;;  %1408 = vrot.lane.b32.xlu0 %v1673_v48, %s2169_s18  ;;  %s1431_s18 = sshll.u32 %s2451_s1, 4  ;;  %s2819_s18 = int_to_ptr.vmem [resolvable:$true] %s1431_s18 }
 0xb1b   : > { %s2031_s14 = scalar_lea.vmem %s2819_s18, 256  ;;  %p2038_p3 = scmp.lt.s32.totalorder %s2819_s18, %s2036_s30 }
 0xb1c   : > { %v751_v52 = vpop.permute.xlu1 %750  ;;  %v619_v53 = vpop.permute.xlu0 %618  ;;  %p2032_p0 = scmp.ne.s32.totalorder %s2819_s18, %s2031_s14 }
 0xb1d   : > { %1622 = vst.msk [vmem:[%s2451_s1 + $0x4] sm:$0xf] %vm487_vm4, %v751_v52  ;;  %1615 = vst.msk [vmem:[%s2453_s19 + $0xc] sm:$0xf] %vm487_vm4, %v619_v53 }
 0xb1e   : > { %1399 = vrot.lane.b32.xlu0 %v1397_v54, %s2172_s3  ;;  %p2033_p8 = pnand %p2032_p0, %p2971_p5  ;;  %s2037_s3 = scalar_lea.vmem %s2036_s30, 512 }
 0xb1f   : > { %p2039_p2 = scmp.lt.s32.totalorder %s2037_s3, %s2031_s14 }
 0xb20   : > { %v1015_v57 = vpop.permute.xlu1 %1014  ;;  %v883_v58 = vpop.permute.xlu0 %882  ;;  %p2034_p11 = pneg %p2033_p8 }
 0xb21   : > { %1636 = vst.msk [vmem:[%s2451_s1 + $0x8] sm:$0xf] %vm487_vm4, %v1015_v57  ;;  %1629 = vst.msk [vmem:[%s2453_s19 + $0x8] sm:$0xf] %vm487_vm4, %v883_v58  ;;  %p2040_p10 = por %p2039_p2, %p2038_p3 }
 0xb23   : > { %p2041_p6 = pnand %p2040_p10, %p2034_p11 }
 0xb24   : > { %v1147_v59 = vpop.permute.xlu0 %1146 }
 0xb25   : > { %1643 = vst.msk [vmem:[%s2453_s19 + $0x4] sm:$0xf] %vm487_vm4, %v1147_v59 }
 0xb84   : > { %v1259_v61 = vpop.permute.xlu1 %1258 }
 0xb85   : > { %1261 = vst.msk [vmem:[#allocation2] sm:$0xff] %vm377_vm2, %v1259_v61 }
 0xb88   : > { %v1279_v62 = vpop.permute.xlu1 %1278  ;;  %v1270_v63 = vpop.permute.xlu0 %1269 }
 0xb89   : > { %1650 = vst.msk [vmem:[%s2451_s1 + $0xc] sm:$0xf] %vm487_vm4, %v1279_v62 }
 0xb8a   : > { %1272 = vst.msk [vmem:[#allocation3] sm:$0xff] %vm377_vm2, %v1270_v63 }
 0xb8b   : > { %2044 = shalt.err (!%p2041_p6)
}
 0xb8c   : > { %s2045_s1 = scalar_lea.hbm %s2817_s26, 256  ;;  %s2049_s11 = scalar_lea.hbm %s2922_s5, 768 }
 0xb8d   : > { %p2046_p4 = scmp.ne.s32.totalorder %s2817_s26, %s2045_s1  ;;  %p2050_p9 = scmp.lt.s32.totalorder %s2817_s26, %s2922_s5 }
 0xb8e   : > { %p2051_p12 = scmp.lt.s32.totalorder %s2049_s11, %s2045_s1 }
 0xb8f   : > { %p2047_p13 = pnand %p2046_p4, %p2971_p5 }
 0xb90   : > { %p2052_p1 = por %p2051_p12, %p2050_p9 }
 0xb91   : > { %p2048_p7 = pneg %p2047_p13 }
 0xb93   : > { %p2053_p0 = pnand %p2052_p1, %p2048_p7 }
 0xb95   : > { %2056 = shalt.err (!%p2053_p0)
}
 0xb96   : > { %s2174_s14 = smov 4   ;;  %s2972_s17 = sshll.u32 %s2453_s19, 4  ;;  %v1389_v0 = vpop.permute.xlu1 %1388  ;;  %v1409_v4 = vpop.permute.xlu0 %1408  ;;  %s2858_s17 = int_to_ptr.vmem [resolvable:$true] %s2972_s17 }
 0xb97   : > { %1772 = dma.vmem_to_hbm [thread:$0]  (%p2971_p5), %s2819_s18, 256, %s2817_s26, %s1413_s29, %s2170_s10, %s2170_s10, %s2174_s14   ;;  %1391 = vst.msk [vmem:[#allocation4] sm:$0xff] %vm377_vm2, %v1389_v0 }
 0xb98   : > { %1411 = vst.msk [vmem:[%s2453_s19] sm:$0xf] %vm487_vm4, %v1409_v4  ;;  %s1418_s20 = scalar_lea.sflag [#allocation14], %s2436_s9  ;;  %s2057_s21 = scalar_lea.vmem %s2858_s17, 256 }
 0xb99   : > { %p2058_p8 = scmp.ne.s32.totalorder %s2858_s17, %s2057_s21  ;;  %p2973_p11 = scmp.ne.s32.totalorder %s2960_s13, 0 }
 0xb9a   : > { %s2175_s30 = smov [#allocation13]  }
 0xb9b   : > { %p2059_p3 = pnand %p2058_p8, %p2973_p11  ;;  %s2061_s18 = sshll.u32 %s2175_s30, 4  ;;  %s2062_s18 = int_to_ptr.vmem [resolvable:$false] %s2061_s18 }
 0xb9c   : > { %s2063_s26 = scalar_lea.vmem %s2062_s18, 512  ;;  %p2064_p5 = scmp.lt.s32.totalorder %s2858_s17, %s2062_s18 }
 0xb9d   : > { %p2060_p2 = pneg %p2059_p3  ;;  %p2065_p10 = scmp.lt.s32.totalorder %s2063_s26, %s2057_s21 }
 0xb9f   : > { %p2066_p6 = por %p2065_p10, %p2064_p5 }
 0xba1   : > { %p2067_p4 = pnand %p2066_p6, %p2060_p2 }
 0xba3   : > { %2070 = shalt.err (!%p2067_p4)
}
 0xba4   : > { %s2071_s19 = scalar_lea.hbm %s2825_s28, 256  ;;  %s2075_s3 = scalar_lea.hbm %s2923_s6, 768 }
 0xba5   : > { %p2072_p13 = scmp.ne.s32.totalorder %s2825_s28, %s2071_s19  ;;  %p2076_p12 = scmp.lt.s32.totalorder %s2825_s28, %s2923_s6 }
 0xba6   : > { %p2077_p1 = scmp.lt.s32.totalorder %s2075_s3, %s2071_s19 }
 0xba7   : > { %p2073_p7 = pnand %p2072_p13, %p2973_p11 }
 0xba8   : > { %p2078_p0 = por %p2077_p1, %p2076_p12 }
 0xba9   : > { %p2074_p9 = pneg %p2073_p7 }
 0xbab   : > { %p2079_p8 = pnand %p2078_p0, %p2074_p9 }
 0xbad   : > { %2082 = shalt.err (!%p2079_p8)
}
 0xbae   : > { %1773 = dma.vmem_to_hbm [thread:$0]  (%p2973_p11), %s2858_s17, 256, %s2825_s28, %s1418_s20, %s2170_s10, %s2170_s10, %s2174_s14   ;;  %v1400_v5 = vpop.permute.xlu0 %1399 }
 0xbaf   : > { %1402 = vst.msk [vmem:[#allocation5] sm:$0xff] %vm377_vm2, %v1400_v5 }
 0xbb0 PF: > { %p1797_p3 = scmp.ge.s32.totalorder %s2157_s27, 2  ;;  %s1463_s7 = sand.u32 1, %s2145_s24  }
 0xbb1   : > { %p2974_p2 = scmp.ne.s32.totalorder %s2945_s8, 0  ;;  %s1464_s11 = scalar_lea.sflag [#allocation8], %s1463_s7 }
 0xbb3   : > { %p1788_p5 = pnand %p1797_p3, %p2974_p2 }
 0xbb5   : > { %p1789_p10 = pneg %p1788_p5 }
 0xbb7   : > { %2124 = dma.done.wait (%p1789_p10), %s1464_s11, 256  }
 0xbb8   : > { %2126 = vsyncadd (%p1789_p10), %s1464_s11, 4294967040  ;;  %s2975_s13 = sld [smem:[#allocation20_spill]] }
 0xbb9   : > { %s2976_s12 = sld [smem:[#allocation22_spill]] }
 0xbbe   : > { %s1472_s21 = sand.u32 1, %s2975_s13  }
 0xbbf   : > { %p2977_p6 = scmp.ne.s32.totalorder %s2976_s12, 0  ;;  %s1473_s10 = scalar_lea.sflag [#allocation14], %s1472_s21 }
 0xbc1   : > { %p1791_p11 = pnand %p1797_p3, %p2977_p6 }
 0xbc3   : > { %p1792_p4 = pneg %p1791_p11 }
 0xbc5   : > { %2128 = dma.done.wait (%p1792_p4), %s1473_s10, 256  }
 0xbc6   : > { %2130 = vsyncadd (%p1792_p4), %s1473_s10, 4294967040  ;;  %s2978_s27 = sld [smem:[#allocation23_spill]]  ;;  %s2981_s21 = smov %s2137_s22 }
 0xbc7   : > { %s2979_s8 = sld [smem:[#allocation21_spill]]  ;;  %s2982_s22 = smov %s2141_s23 }
 0xbc8   : > { %s2980_s26 = sld [smem:[#allocation24_spill]]  ;;  %s2983_s23 = smov %s2381_s16 }
 0xbc9   : > { %s2984_s24 = smov %s2149_s25 }
 0xbcc   : > { %p26_p13 = scmp.ge.s32.totalorder %s2978_s27, 5  }
 0xbcd   : > { %s2985_s25 = smov %s2979_s8 }
 0xbce   :  { %28 = sbr.rel (!%p26_p13) target bundleno = 14 (0xe), region = 135 }
 0xbd3   :  { %1478 = vsyncpa [#allocation7], 1 }
 0xbd4   :  { %1480 = vsyncpa [#allocation7 + $0x1], 1 }
 0xbd5   :  { %1481 = vsyncpa [#allocation10], 1 }
 0xbd6   :  { %1483 = vsyncpa [#allocation10 + $0x1], 1 }
 0xbd7   :  { %1484 = vsyncpa [#allocation8], 1 }
 0xbd8   :  { %1486 = vsyncpa [#allocation8 + $0x1], 1 }
 0xbd9   :  { %1487 = vsyncpa [#allocation14], 1 }
 0xbda   :  { %1489 = vsyncpa [#allocation14 + $0x1], 1 }

</bundles_post_ra>
